<compile_context>
chip_gen: v7x
topology: tpu7x:2x2x1
jax: 0.10.0
libtpu: 0.0.40
codegen_flags: <defaults>
</compile_context>

<pallas_src>
import functools

import jax
import jax.numpy as jnp
from jax.experimental import pallas as pl
from jax.experimental.pallas import tpu as pltpu


# ----------------------------- Pallas kernels ------------------------------ #

def _conv_act_kernel(p_ref, w_ref, b_ref, o_ref, *, act):
    """out = act(W @ patches + b) for one (C,K)x(K,TM) tile (channel-major)."""
    acc = jnp.dot(w_ref[...], p_ref[...], preferred_element_type=jnp.float32)
    acc = acc + b_ref[...]                           # (C,1) broadcast over cols
    if act == "leaky":
        acc = jnp.where(acc >= 0.0, acc, 0.2 * acc)
    else:  # sigmoid: exp + approx reciprocal both ride the EUP slot
        acc = pl.reciprocal(1.0 + jnp.exp(-acc), approx=True)
    o_ref[...] = acc.astype(o_ref.dtype)


def _conv_bn_leaky_fused_kernel(p_ref, w_ref, g_ref, bt_ref, o_ref, *, eps):
    """Fully fused conv -> train-mode BN -> LeakyReLU, single store.

    Whole (K,M) patch slab and (C,M) output are resident in VMEM, so BN stats
    are exact (centered variance from the f32 accumulator) and the activation
    hits HBM exactly once, in bf16.
    """
    acc = jnp.dot(w_ref[...], p_ref[...], preferred_element_type=jnp.float32)  # (C,M)
    m = acc.shape[1]
    mean = jnp.sum(acc, axis=1, keepdims=True) * (1.0 / m)           # (C,1)
    cen = acc - mean
    var = jnp.sum(cen * cen, axis=1, keepdims=True) * (1.0 / m)      # (C,1)
    scale = g_ref[...] * jax.lax.rsqrt(var + eps)                    # EUP rsqrt
    v = cen * scale + bt_ref[...]
    o_ref[...] = jnp.where(v >= 0.0, v, 0.2 * v).astype(o_ref.dtype)


def _conv_stats_kernel(p_ref, w_ref, y_ref, sum_ref, sq_ref):
    """Fallback pass 1: conv (no bias/act) + lane-dense per-tile partial stats.

    Padded patch columns are exact zeros, so they contribute 0 to both
    partials; the wrapper divides by the true (unpadded) column count.
    """
    acc = jnp.dot(w_ref[...], p_ref[...], preferred_element_type=jnp.float32)
    y_ref[...] = acc.astype(y_ref.dtype)
    sum_ref[...] = jnp.sum(acc, axis=1)[None, None, :]        # (1,1,C) lane-dense
    sq_ref[...] = jnp.sum(acc * acc, axis=1)[None, None, :]   # (1,1,C)


def _affine_leaky_kernel(y_ref, s_ref, t_ref, o_ref):
    """Fallback pass 2: out = leaky_0.2(y * scale + shift) (folded BN)."""
    v = y_ref[...].astype(jnp.float32) * s_ref[...] + t_ref[...]
    o_ref[...] = jnp.where(v >= 0.0, v, 0.2 * v).astype(o_ref.dtype)


# ------------------------------ tiling helpers ------------------------------ #

_TM_CAP = 512      # keeps double-buffered deep-layer blocks inside v5e/v7x VMEM


def _round_up(x, m):
    return ((x + m - 1) // m) * m


def _pick_tile(m):
    """128-aligned column tile: prefer exact divisors of m (no pad + slice
    copies) and target >= 8 grid steps (>= 4 per v7x TensorCore) so BlockSpec
    double-buffering hides HBM latency; floor 128, cap _TM_CAP."""
    if m <= 128:
        return 128
    target = min(_TM_CAP, max(128, ((m // 8) // 128) * 128))
    for tm in range(target, 127, -128):
        if m % tm == 0:
            return tm
    return target  # no friendly divisor -> pad


def _fits_vmem(k, m, c, budget=16 << 20):
    """Rough footprint of the fully-fused / full-extent path (bf16 patches +
    bf16 weights + f32 accumulator + bf16 output + per-channel vectors)."""
    need = k * m * 2 + c * k * 2 + c * m * 6 + 8 * c * 4
    return need <= budget


def _vmem_limit(*nbytes):
    """Explicit scoped-VMEM limit: 2x (double-buffering) + margin, clamped so
    it stays below v7x's 64 MiB physical VMEM."""
    est = 2 * sum(int(b) for b in nbytes) + (8 << 20)
    return int(min(48 << 20, max(16 << 20, est)))


# ------------------------------ layer wrappers ------------------------------ #

def _conv_act_small(patches, w2d, bias, act, out_dtype):
    """Single full-extent block (no padding) for tiny layers, e.g. the final
    1-channel sigmoid conv where M = batch."""
    k, m = patches.shape
    c = w2d.shape[0]
    limit = _vmem_limit(k * m * 2, c * k * 2, c * m * 6, c * 4)
    return pl.pallas_call(
        functools.partial(_conv_act_kernel, act=act),
        out_shape=jax.ShapeDtypeStruct((c, m), out_dtype),
        grid=(1,),
        in_specs=[
            pl.BlockSpec((k, m), lambda i: (0, 0)),
            pl.BlockSpec((c, k), lambda i: (0, 0)),
            pl.BlockSpec((c, 1), lambda i: (0, 0)),
        ],
        out_specs=pl.BlockSpec((c, m), lambda i: (0, 0)),
        compiler_params=pltpu.CompilerParams(
            dimension_semantics=("arbitrary",), vmem_limit_bytes=limit),
    )(patches, w2d, bias.reshape(c, 1).astype(jnp.float32))


def conv_act(patches, w2d, bias, act, out_dtype):
    """(C,K) @ (K,M) + bias, then activation.  Channel-major, lane-dense."""
    k, m = patches.shape
    c = w2d.shape[0]
    if (m % 128 != 0 or m <= 128) and _fits_vmem(k, m, c):
        return _conv_act_small(patches, w2d, bias, act, out_dtype)

    tm = _pick_tile(m)
    mp = _round_up(m, tm)
    pp = patches if mp == m else jnp.pad(patches, ((0, 0), (0, mp - m)))
    ob = jnp.dtype(out_dtype).itemsize
    limit = _vmem_limit(k * tm * 2, c * k * 2, c * tm * ob, c * 4)
    out = pl.pallas_call(
        functools.partial(_conv_act_kernel, act=act),
        out_shape=jax.ShapeDtypeStruct((c, mp), out_dtype),
        grid=(mp // tm,),
        in_specs=[
            pl.BlockSpec((k, tm), lambda i: (0, i)),
            pl.BlockSpec((c, k), lambda i: (0, 0)),
            pl.BlockSpec((c, 1), lambda i: (0, 0)),
        ],
        out_specs=pl.BlockSpec((c, tm), lambda i: (0, i)),
        compiler_params=pltpu.CompilerParams(
            dimension_semantics=("parallel",), vmem_limit_bytes=limit),
    )(pp, w2d, bias.reshape(c, 1).astype(jnp.float32))
    return out if mp == m else out[:, :m]


def conv_bn_leaky(patches, w2d, gamma, beta, eps=1e-5):
    """Conv (bias dropped: cancels vs BN mean) + train-mode BN + LeakyReLU.

    Fully fused single pallas_call when the layer fits in VMEM; otherwise a
    tiled two-pass (conv+partial-stats, then affine+leaky) fallback.
    """
    k, m = patches.shape
    c = w2d.shape[0]

    if _fits_vmem(k, m, c):
        limit = _vmem_limit(k * m * 2, c * k * 2, c * m * 6, 4 * c * 4)
        return pl.pallas_call(
            functools.partial(_conv_bn_leaky_fused_kernel, eps=eps),
            out_shape=jax.ShapeDtypeStruct((c, m), jnp.bfloat16),
            grid=(1,),
            in_specs=[
                pl.BlockSpec((k, m), lambda i: (0, 0)),
                pl.BlockSpec((c, k), lambda i: (0, 0)),
                pl.BlockSpec((c, 1), lambda i: (0, 0)),
                pl.BlockSpec((c, 1), lambda i: (0, 0)),
            ],
            out_specs=pl.BlockSpec((c, m), lambda i: (0, 0)),
            compiler_params=pltpu.CompilerParams(
                dimension_semantics=("arbitrary",), vmem_limit_bytes=limit),
        )(patches, w2d,
          gamma.reshape(c, 1).astype(jnp.float32),
          beta.reshape(c, 1).astype(jnp.float32))

    # ---- tiled two-pass fallback for layers too big to fuse ---- #
    tm = _pick_tile(m)
    mp = _round_up(m, tm)
    g = mp // tm
    pp = patches if mp == m else jnp.pad(patches, ((0, 0), (0, mp - m)))

    limit1 = _vmem_limit(k * tm * 2, c * k * 2, c * tm * 2, 2 * c * 4)
    y, psum, psq = pl.pallas_call(
        _conv_stats_kernel,
        out_shape=(
            jax.ShapeDtypeStruct((c, mp), jnp.bfloat16),
            jax.ShapeDtypeStruct((g, 1, c), jnp.float32),
            jax.ShapeDtypeStruct((g, 1, c), jnp.float32),
        ),
        grid=(g,),
        in_specs=[
            pl.BlockSpec((k, tm), lambda i: (0, i)),
            pl.BlockSpec((c, k), lambda i: (0, 0)),
        ],
        out_specs=[
            pl.BlockSpec((c, tm), lambda i: (0, i)),
            pl.BlockSpec((1, 1, c), lambda i: (i, 0, 0)),
            pl.BlockSpec((1, 1, c), lambda i: (i, 0, 0)),
        ],
        compiler_params=pltpu.CompilerParams(
            dimension_semantics=("parallel",), vmem_limit_bytes=limit1),
    )(pp, w2d)

    s = jnp.sum(psum, axis=(0, 1))               # (C,)
    ss = jnp.sum(psq, axis=(0, 1))                # (C,)
    mean = s / m
    var = ss / m - mean * mean                    # padded cols are exact zeros
    scale = gamma / jnp.sqrt(var + eps)
    shift = beta - mean * scale

    limit2 = _vmem_limit(c * tm * 2, c * tm * 2, 2 * c * 4)
    out = pl.pallas_call(
        _affine_leaky_kernel,
        out_shape=jax.ShapeDtypeStruct((c, mp), jnp.bfloat16),
        grid=(g,),
        in_specs=[
            pl.BlockSpec((c, tm), lambda i: (0, i)),
            pl.BlockSpec((c, 1), lambda i: (0, 0)),
            pl.BlockSpec((c, 1), lambda i: (0, 0)),
        ],
        out_specs=pl.BlockSpec((c, tm), lambda i: (0, i)),
        compiler_params=pltpu.CompilerParams(
            dimension_semantics=("parallel",), vmem_limit_bytes=limit2),
    )(y, scale.reshape(c, 1).astype(jnp.float32),
      shift.reshape(c, 1).astype(jnp.float32))
    return out if mp == m else out[:, :m]


def im2col_cm(x, k, s, p):
    """Channel-major im2col.

    x: (C, N, H, W) -> patches (C*k*k, N*Ho*Wo), K ordered as (c, kh, kw),
    which matches the PyTorch OIHW weight's natural w.reshape(C_out, C_in*k*k).
    Stays in x.dtype (bf16), so the materialized slab is half the f32 size.
    """
    c, n, h, w = x.shape
    xp = jnp.pad(x, ((0, 0), (0, 0), (p, p), (p, p))) if p else x
    ho = (h + 2 * p - k) // s + 1
    wo = (w + 2 * p - k) // s + 1
    cols = [xp[:, :, dh:dh + ho * s:s, dw:dw + wo * s:s]
            for dh in range(k) for dw in range(k)]       # each (C,N,Ho,Wo)
    pat = jnp.stack(cols, axis=1)                        # (C, k*k, N, Ho, Wo)
    return pat.reshape(c * k * k, n * ho * wo), n, ho, wo


# ---------------------------- model definition ------------------------------ #

# (stride, pad, has_batchnorm, activation) per conv layer — mirrors the
# nn.Sequential in the PyTorch Discriminator.
_LAYER_CFG = [
    (2, 1, False, "leaky"),
    (2, 1, True, "leaky"),
    (2, 1, True, "leaky"),
    (2, 1, True, "leaky"),
    (1, 0, False, "sigmoid"),
]


def init_params(key, channels_img, features_d):
    dims = [
        (features_d, channels_img),
        (features_d * 2, features_d),
        (features_d * 4, features_d * 2),
        (features_d * 8, features_d * 4),
        (1, features_d * 8),
    ]
    params = []
    for i, (co, ci) in enumerate(dims):
        key, k1, k2 = jax.random.split(key, 3)
        layer = {
            "w": jax.random.normal(k1, (co, ci, 4, 4), jnp.float32) * 0.05,
            "b": jax.random.normal(k2, (co,), jnp.float32) * 0.01,
        }
        if _LAYER_CFG[i][2]:  # BatchNorm2d default init: weight=1, bias=0
            layer["gamma"] = jnp.ones((co,), jnp.float32)
            layer["beta"] = jnp.zeros((co,), jnp.float32)
        params.append(layer)
    return params


def discriminator_forward(x, params):
    # One layout swap to channel-major (C, N, H, W) + single bf16 cast; the
    # activation stays bf16 channel-major between layers (lane-dense stores,
    # half the inter-layer HBM bytes).
    h = jnp.transpose(x, (1, 0, 2, 3)).astype(jnp.bfloat16)
    for (s, p, bn, act), lp in zip(_LAYER_CFG, params):
        w = lp["w"]
        co, ci, kh, kw = w.shape
        patches, n, ho, wo = im2col_cm(h, kh, s, p)
        w2d = w.reshape(co, ci * kh * kw).astype(jnp.bfloat16)   # (C_out, K)
        if bn:
            # conv bias dropped: cancels exactly against BN mean subtraction
            y = conv_bn_leaky(patches, w2d, lp["gamma"], lp["beta"])
        else:
            out_dtype = jnp.float32 if act == "sigmoid" else jnp.bfloat16
            y = conv_act(patches, w2d, lp["b"], act, out_dtype)
        h = y.reshape(co, n, ho, wo)                 # stay channel-major
    return jnp.transpose(h, (1, 0, 2, 3)).astype(jnp.float32)   # (N,1,1,1)


# --------------------------- pure-JAX reference ----------------------------- #

def reference_forward(x, params):
    h = x
    for (s, p, bn, act), lp in zip(_LAYER_CFG, params):
        h = jax.lax.conv_general_dilated(
            h, lp["w"], (s, s), [(p, p), (p, p)],
            dimension_numbers=("NCHW", "OIHW", "NCHW"))
        h = h + lp["b"].reshape(1, -1, 1, 1)
        if bn:
            mean = jnp.mean(h, axis=(0, 2, 3), keepdims=True)
            var = jnp.mean(jnp.square(h - mean), axis=(0, 2, 3), keepdims=True)
            h = (h - mean) / jnp.sqrt(var + 1e-5)
            h = h * lp["gamma"].reshape(1, -1, 1, 1) + lp["beta"].reshape(1, -1, 1, 1)
        if act == "leaky":
            h = jnp.where(h >= 0.0, h, 0.2 * h)
        else:
            h = jax.nn.sigmoid(h)
    return h


# --------------------------------- main ------------------------------------- #

if __name__ == "__main__":
    channels_img, features_d = 3, 8
    N, H, W = 2, 64, 64          # DCGAN discriminator expects 64x64 -> (N,1,1,1)

    key = jax.random.PRNGKey(0)
    kx, kp = jax.random.split(key)
    x = jax.random.normal(kx, (N, channels_img, H, W), jnp.float32)
    params = init_params(kp, channels_img, features_d)

    fwd = jax.jit(discriminator_forward)
    out = jax.block_until_ready(fwd(x, params))
    assert out.shape == (N, 1, 1, 1), out.shape

    ref = jax.block_until_ready(reference_forward(x, params))
    max_diff = float(jnp.max(jnp.abs(out - ref)))
    assert max_diff < 5e-2, f"mismatch vs reference: max_diff={max_diff}"

    print("KERNEL_OK")
</pallas_src>

<mosaic_0001>
module attributes {stable_mosaic.version = 11 : i64} {
  func.func @_conv_act_kernel(%arg0: i32, %arg1: memref<48x256xbf16, #tpu.memory_space<vmem>>, %arg2: memref<8x48xbf16, #tpu.memory_space<vmem>>, %arg3: memref<8x1xf32, #tpu.memory_space<vmem>>, %arg4: memref<8x256xbf16, #tpu.memory_space<vmem>>) attributes {dimension_semantics = [#tpu.dimension_semantics<parallel>], iteration_bounds = array<i64: 8>, scalar_prefetch = 0 : i64, scratch_operands = 0 : i64, tpu.core_type = #tpu.core_type<tc>, window_params = [{transform_indices = @transform_0, window_bounds = array<i64: 48, 256>}, {pipeline_mode = #tpu.pipeline_mode<synchronous>, transform_indices = @transform_1, window_bounds = array<i64: 8, 48>}, {pipeline_mode = #tpu.pipeline_mode<synchronous>, transform_indices = @transform_2, window_bounds = array<i64: 8, 1>}, {transform_indices = @transform_3, window_bounds = array<i64: 8, 256>}]} {
    %c0 = arith.constant 0 : index
    %c0_0 = arith.constant 0 : index
    %0 = vector.load %arg2[%c0, %c0_0] : memref<8x48xbf16, #tpu.memory_space<vmem>>, vector<8x48xbf16>
    %c0_1 = arith.constant 0 : index
    %c0_2 = arith.constant 0 : index
    %1 = vector.load %arg1[%c0_1, %c0_2] : memref<48x256xbf16, #tpu.memory_space<vmem>>, vector<48x256xbf16>
    %cst = arith.constant dense<0.000000e+00> : vector<8x256xf32>
    %2 = tpu.matmul %0, %1, %cst {dimension_numbers = #tpu.dot_dimension_numbers<[1], [0], [0], [1], [0, 0, 1, 1], [], []>} : vector<8x48xbf16>, vector<48x256xbf16>, vector<8x256xf32> -> vector<8x256xf32>
    %c0_3 = arith.constant 0 : index
    %c0_4 = arith.constant 0 : index
    %3 = vector.load %arg3[%c0_3, %c0_4] : memref<8x1xf32, #tpu.memory_space<vmem>>, vector<8x1xf32>
    %4 = vector.broadcast %3 : vector<8x1xf32> to vector<8x256xf32>
    %5 = arith.addf %2, %4 : vector<8x256xf32>
    %cst_5 = arith.constant 0.000000e+00 : f32
    %6 = vector.broadcast %cst_5 : f32 to vector<8x256xf32>
    %7 = arith.cmpf oge, %5, %6 : vector<8x256xf32>
    %cst_6 = arith.constant 2.000000e-01 : f32
    %8 = vector.broadcast %cst_6 : f32 to vector<8x256xf32>
    %9 = arith.mulf %8, %5 : vector<8x256xf32>
    %10 = arith.select %7, %5, %9 : vector<8x256xi1>, vector<8x256xf32>
    %11 = arith.truncf %10 : vector<8x256xf32> to vector<8x256xbf16>
    %c0_7 = arith.constant 0 : index
    %c0_8 = arith.constant 0 : index
    %12 = vector.load %arg4[%c0_7, %c0_8] : memref<8x256xbf16, #tpu.memory_space<vmem>>, vector<8x256xbf16>
    tpu.vector_store %arg4[%c0_7, %c0_8], %11 {strides = array<i32>} : memref<8x256xbf16, #tpu.memory_space<vmem>>, vector<8x256xbf16>,
    return
  }
  func.func @transform_0(%arg0: i32) -> (i32, i32) {
    %c0_i32 = arith.constant 0 : i32
    %c0_i32_0 = arith.constant 0 : i32
    return %c0_i32, %arg0 : i32, i32
  }
  func.func @transform_1(%arg0: i32) -> (i32, i32) {
    %c0_i32 = arith.constant 0 : i32
    %c0_i32_0 = arith.constant 0 : i32
    %c0_i32_1 = arith.constant 0 : i32
    return %c0_i32, %c0_i32_0 : i32, i32
  }
  func.func @transform_2(%arg0: i32) -> (i32, i32) {
    %c0_i32 = arith.constant 0 : i32
    %c0_i32_0 = arith.constant 0 : i32
    %c0_i32_1 = arith.constant 0 : i32
    return %c0_i32, %c0_i32_0 : i32, i32
  }
  func.func @transform_3(%arg0: i32) -> (i32, i32) {
    %c0_i32 = arith.constant 0 : i32
    %c0_i32_0 = arith.constant 0 : i32
    return %c0_i32, %arg0 : i32, i32
  }
}

module attributes {stable_mosaic.version = 11 : i64} {
  func.func @_conv_bn_leaky_fused_kernel(%arg0: i32, %arg1: memref<128x512xbf16, #tpu.memory_space<vmem>>, %arg2: memref<16x128xbf16, #tpu.memory_space<vmem>>, %arg3: memref<16x1xf32, #tpu.memory_space<vmem>>, %arg4: memref<16x1xf32, #tpu.memory_space<vmem>>, %arg5: memref<16x512xbf16, #tpu.memory_space<vmem>>) attributes {dimension_semantics = [#tpu.dimension_semantics<arbitrary>], iteration_bounds = array<i64: 1>, scalar_prefetch = 0 : i64, scratch_operands = 0 : i64, tpu.core_type = #tpu.core_type<tc>, window_params = [{pipeline_mode = #tpu.pipeline_mode<synchronous>, transform_indices = @transform_0, window_bounds = array<i64: 128, 512>}, {pipeline_mode = #tpu.pipeline_mode<synchronous>, transform_indices = @transform_1, window_bounds = array<i64: 16, 128>}, {pipeline_mode = #tpu.pipeline_mode<synchronous>, transform_indices = @transform_2, window_bounds = array<i64: 16, 1>}, {pipeline_mode = #tpu.pipeline_mode<synchronous>, transform_indices = @transform_3, window_bounds = array<i64: 16, 1>}, {pipeline_mode = #tpu.pipeline_mode<synchronous>, transform_indices = @transform_4, window_bounds = array<i64: 16, 512>}]} {
    %c0 = arith.constant 0 : index
    %c0_0 = arith.constant 0 : index
    %0 = vector.load %arg2[%c0, %c0_0] : memref<16x128xbf16, #tpu.memory_space<vmem>>, vector<16x128xbf16>
    %c0_1 = arith.constant 0 : index
    %c0_2 = arith.constant 0 : index
    %1 = vector.load %arg1[%c0_1, %c0_2] : memref<128x512xbf16, #tpu.memory_space<vmem>>, vector<128x512xbf16>
    %cst = arith.constant dense<0.000000e+00> : vector<16x512xf32>
    %2 = tpu.matmul %0, %1, %cst {dimension_numbers = #tpu.dot_dimension_numbers<[1], [0], [0], [1], [0, 0, 1, 1], [], []>} : vector<16x128xbf16>, vector<128x512xbf16>, vector<16x512xf32> -> vector<16x512xf32>
    %cst_3 = arith.constant dense<0.000000e+00> : vector<16xf32>
    %3 = vector.multi_reduction <add>, %2, %cst_3 [1] : vector<16x512xf32> to vector<16xf32>
    %4 = vector.shape_cast %3 : vector<16xf32> to vector<16x1xf32>
    %cst_4 = arith.constant 0.001953125 : f32
    %5 = vector.broadcast %cst_4 : f32 to vector<16x1xf32>
    %6 = arith.mulf %4, %5 : vector<16x1xf32>
    %7 = vector.broadcast %6 : vector<16x1xf32> to vector<16x512xf32>
    %8 = arith.subf %2, %7 : vector<16x512xf32>
    %9 = arith.mulf %8, %8 : vector<16x512xf32>
    %cst_5 = arith.constant dense<0.000000e+00> : vector<16xf32>
    %10 = vector.multi_reduction <add>, %9, %cst_5 [1] : vector<16x512xf32> to vector<16xf32>
    %11 = vector.shape_cast %10 : vector<16xf32> to vector<16x1xf32>
    %cst_6 = arith.constant 0.001953125 : f32
    %12 = vector.broadcast %cst_6 : f32 to vector<16x1xf32>
    %13 = arith.mulf %11, %12 : vector<16x1xf32>
    %c0_7 = arith.constant 0 : index
    %c0_8 = arith.constant 0 : index
    %14 = vector.load %arg3[%c0_7, %c0_8] : memref<16x1xf32, #tpu.memory_space<vmem>>, vector<16x1xf32>
    %cst_9 = arith.constant 9.99999974E-6 : f32
    %15 = vector.broadcast %cst_9 : f32 to vector<16x1xf32>
    %16 = arith.addf %13, %15 : vector<16x1xf32>
    %17 = math.rsqrt %16 : vector<16x1xf32>
    %18 = arith.mulf %14, %17 : vector<16x1xf32>
    %19 = vector.broadcast %18 : vector<16x1xf32> to vector<16x512xf32>
    %20 = arith.mulf %8, %19 : vector<16x512xf32>
    %c0_10 = arith.constant 0 : index
    %c0_11 = arith.constant 0 : index
    %21 = vector.load %arg4[%c0_10, %c0_11] : memref<16x1xf32, #tpu.memory_space<vmem>>, vector<16x1xf32>
    %22 = vector.broadcast %21 : vector<16x1xf32> to vector<16x512xf32>
    %23 = arith.addf %20, %22 : vector<16x512xf32>
    %cst_12 = arith.constant 0.000000e+00 : f32
    %24 = vector.broadcast %cst_12 : f32 to vector<16x512xf32>
    %25 = arith.cmpf oge, %23, %24 : vector<16x512xf32>
    %cst_13 = arith.constant 2.000000e-01 : f32
    %26 = vector.broadcast %cst_13 : f32 to vector<16x512xf32>
    %27 = arith.mulf %26, %23 : vector<16x512xf32>
    %28 = arith.select %25, %23, %27 : vector<16x512xi1>, vector<16x512xf32>
    %29 = arith.truncf %28 : vector<16x512xf32> to vector<16x512xbf16>
    %c0_14 = arith.constant 0 : index
    %c0_15 = arith.constant 0 : index
    %30 = vector.load %arg5[%c0_14, %c0_15] : memref<16x512xbf16, #tpu.memory_space<vmem>>, vector<16x512xbf16>
    tpu.vector_store %arg5[%c0_14, %c0_15], %29 {strides = array<i32>} : memref<16x512xbf16, #tpu.memory_space<vmem>>, vector<16x512xbf16>,
    return
  }
  func.func @transform_0(%arg0: i32) -> (i32, i32) {
    %c0_i32 = arith.constant 0 : i32
    %c0_i32_0 = arith.constant 0 : i32
    %c0_i32_1 = arith.constant 0 : i32
    return %c0_i32, %c0_i32_0 : i32, i32
  }
  func.func @transform_1(%arg0: i32) -> (i32, i32) {
    %c0_i32 = arith.constant 0 : i32
    %c0_i32_0 = arith.constant 0 : i32
    %c0_i32_1 = arith.constant 0 : i32
    return %c0_i32, %c0_i32_0 : i32, i32
  }
  func.func @transform_2(%arg0: i32) -> (i32, i32) {
    %c0_i32 = arith.constant 0 : i32
    %c0_i32_0 = arith.constant 0 : i32
    %c0_i32_1 = arith.constant 0 : i32
    return %c0_i32, %c0_i32_0 : i32, i32
  }
  func.func @transform_3(%arg0: i32) -> (i32, i32) {
    %c0_i32 = arith.constant 0 : i32
    %c0_i32_0 = arith.constant 0 : i32
    %c0_i32_1 = arith.constant 0 : i32
    return %c0_i32, %c0_i32_0 : i32, i32
  }
  func.func @transform_4(%arg0: i32) -> (i32, i32) {
    %c0_i32 = arith.constant 0 : i32
    %c0_i32_0 = arith.constant 0 : i32
    %c0_i32_1 = arith.constant 0 : i32
    return %c0_i32, %c0_i32_0 : i32, i32
  }
}

module attributes {stable_mosaic.version = 11 : i64} {
  func.func @_conv_bn_leaky_fused_kernel(%arg0: i32, %arg1: memref<256x128xbf16, #tpu.memory_space<vmem>>, %arg2: memref<32x256xbf16, #tpu.memory_space<vmem>>, %arg3: memref<32x1xf32, #tpu.memory_space<vmem>>, %arg4: memref<32x1xf32, #tpu.memory_space<vmem>>, %arg5: memref<32x128xbf16, #tpu.memory_space<vmem>>) attributes {dimension_semantics = [#tpu.dimension_semantics<arbitrary>], iteration_bounds = array<i64: 1>, scalar_prefetch = 0 : i64, scratch_operands = 0 : i64, tpu.core_type = #tpu.core_type<tc>, window_params = [{pipeline_mode = #tpu.pipeline_mode<synchronous>, transform_indices = @transform_0, window_bounds = array<i64: 256, 128>}, {pipeline_mode = #tpu.pipeline_mode<synchronous>, transform_indices = @transform_1, window_bounds = array<i64: 32, 256>}, {pipeline_mode = #tpu.pipeline_mode<synchronous>, transform_indices = @transform_2, window_bounds = array<i64: 32, 1>}, {pipeline_mode = #tpu.pipeline_mode<synchronous>, transform_indices = @transform_3, window_bounds = array<i64: 32, 1>}, {pipeline_mode = #tpu.pipeline_mode<synchronous>, transform_indices = @transform_4, window_bounds = array<i64: 32, 128>}]} {
    %c0 = arith.constant 0 : index
    %c0_0 = arith.constant 0 : index
    %0 = vector.load %arg2[%c0, %c0_0] : memref<32x256xbf16, #tpu.memory_space<vmem>>, vector<32x256xbf16>
    %c0_1 = arith.constant 0 : index
    %c0_2 = arith.constant 0 : index
    %1 = vector.load %arg1[%c0_1, %c0_2] : memref<256x128xbf16, #tpu.memory_space<vmem>>, vector<256x128xbf16>
    %cst = arith.constant dense<0.000000e+00> : vector<32x128xf32>
    %2 = tpu.matmul %0, %1, %cst {dimension_numbers = #tpu.dot_dimension_numbers<[1], [0], [0], [1], [0, 0, 1, 1], [], []>} : vector<32x256xbf16>, vector<256x128xbf16>, vector<32x128xf32> -> vector<32x128xf32>
    %cst_3 = arith.constant dense<0.000000e+00> : vector<32xf32>
    %3 = vector.multi_reduction <add>, %2, %cst_3 [1] : vector<32x128xf32> to vector<32xf32>
    %4 = vector.shape_cast %3 : vector<32xf32> to vector<32x1xf32>
    %cst_4 = arith.constant 7.812500e-03 : f32
    %5 = vector.broadcast %cst_4 : f32 to vector<32x1xf32>
    %6 = arith.mulf %4, %5 : vector<32x1xf32>
    %7 = vector.broadcast %6 : vector<32x1xf32> to vector<32x128xf32>
    %8 = arith.subf %2, %7 : vector<32x128xf32>
    %9 = arith.mulf %8, %8 : vector<32x128xf32>
    %cst_5 = arith.constant dense<0.000000e+00> : vector<32xf32>
    %10 = vector.multi_reduction <add>, %9, %cst_5 [1] : vector<32x128xf32> to vector<32xf32>
    %11 = vector.shape_cast %10 : vector<32xf32> to vector<32x1xf32>
    %cst_6 = arith.constant 7.812500e-03 : f32
    %12 = vector.broadcast %cst_6 : f32 to vector<32x1xf32>
    %13 = arith.mulf %11, %12 : vector<32x1xf32>
    %c0_7 = arith.constant 0 : index
    %c0_8 = arith.constant 0 : index
    %14 = vector.load %arg3[%c0_7, %c0_8] : memref<32x1xf32, #tpu.memory_space<vmem>>, vector<32x1xf32>
    %cst_9 = arith.constant 9.99999974E-6 : f32
    %15 = vector.broadcast %cst_9 : f32 to vector<32x1xf32>
    %16 = arith.addf %13, %15 : vector<32x1xf32>
    %17 = math.rsqrt %16 : vector<32x1xf32>
    %18 = arith.mulf %14, %17 : vector<32x1xf32>
    %19 = vector.broadcast %18 : vector<32x1xf32> to vector<32x128xf32>
    %20 = arith.mulf %8, %19 : vector<32x128xf32>
    %c0_10 = arith.constant 0 : index
    %c0_11 = arith.constant 0 : index
    %21 = vector.load %arg4[%c0_10, %c0_11] : memref<32x1xf32, #tpu.memory_space<vmem>>, vector<32x1xf32>
    %22 = vector.broadcast %21 : vector<32x1xf32> to vector<32x128xf32>
    %23 = arith.addf %20, %22 : vector<32x128xf32>
    %cst_12 = arith.constant 0.000000e+00 : f32
    %24 = vector.broadcast %cst_12 : f32 to vector<32x128xf32>
    %25 = arith.cmpf oge, %23, %24 : vector<32x128xf32>
    %cst_13 = arith.constant 2.000000e-01 : f32
    %26 = vector.broadcast %cst_13 : f32 to vector<32x128xf32>
    %27 = arith.mulf %26, %23 : vector<32x128xf32>
    %28 = arith.select %25, %23, %27 : vector<32x128xi1>, vector<32x128xf32>
    %29 = arith.truncf %28 : vector<32x128xf32> to vector<32x128xbf16>
    %c0_14 = arith.constant 0 : index
    %c0_15 = arith.constant 0 : index
    %30 = vector.load %arg5[%c0_14, %c0_15] : memref<32x128xbf16, #tpu.memory_space<vmem>>, vector<32x128xbf16>
    tpu.vector_store %arg5[%c0_14, %c0_15], %29 {strides = array<i32>} : memref<32x128xbf16, #tpu.memory_space<vmem>>, vector<32x128xbf16>,
    return
  }
  func.func @transform_0(%arg0: i32) -> (i32, i32) {
    %c0_i32 = arith.constant 0 : i32
    %c0_i32_0 = arith.constant 0 : i32
    %c0_i32_1 = arith.constant 0 : i32
    return %c0_i32, %c0_i32_0 : i32, i32
  }
  func.func @transform_1(%arg0: i32) -> (i32, i32) {
    %c0_i32 = arith.constant 0 : i32
    %c0_i32_0 = arith.constant 0 : i32
    %c0_i32_1 = arith.constant 0 : i32
    return %c0_i32, %c0_i32_0 : i32, i32
  }
  func.func @transform_2(%arg0: i32) -> (i32, i32) {
    %c0_i32 = arith.constant 0 : i32
    %c0_i32_0 = arith.constant 0 : i32
    %c0_i32_1 = arith.constant 0 : i32
    return %c0_i32, %c0_i32_0 : i32, i32
  }
  func.func @transform_3(%arg0: i32) -> (i32, i32) {
    %c0_i32 = arith.constant 0 : i32
    %c0_i32_0 = arith.constant 0 : i32
    %c0_i32_1 = arith.constant 0 : i32
    return %c0_i32, %c0_i32_0 : i32, i32
  }
  func.func @transform_4(%arg0: i32) -> (i32, i32) {
    %c0_i32 = arith.constant 0 : i32
    %c0_i32_0 = arith.constant 0 : i32
    %c0_i32_1 = arith.constant 0 : i32
    return %c0_i32, %c0_i32_0 : i32, i32
  }
}

module attributes {stable_mosaic.version = 11 : i64} {
  func.func @_conv_bn_leaky_fused_kernel(%arg0: i32, %arg1: memref<512x32xbf16, #tpu.memory_space<vmem>>, %arg2: memref<64x512xbf16, #tpu.memory_space<vmem>>, %arg3: memref<64x1xf32, #tpu.memory_space<vmem>>, %arg4: memref<64x1xf32, #tpu.memory_space<vmem>>, %arg5: memref<64x32xbf16, #tpu.memory_space<vmem>>) attributes {dimension_semantics = [#tpu.dimension_semantics<arbitrary>], iteration_bounds = array<i64: 1>, scalar_prefetch = 0 : i64, scratch_operands = 0 : i64, tpu.core_type = #tpu.core_type<tc>, window_params = [{pipeline_mode = #tpu.pipeline_mode<synchronous>, transform_indices = @transform_0, window_bounds = array<i64: 512, 32>}, {pipeline_mode = #tpu.pipeline_mode<synchronous>, transform_indices = @transform_1, window_bounds = array<i64: 64, 512>}, {pipeline_mode = #tpu.pipeline_mode<synchronous>, transform_indices = @transform_2, window_bounds = array<i64: 64, 1>}, {pipeline_mode = #tpu.pipeline_mode<synchronous>, transform_indices = @transform_3, window_bounds = array<i64: 64, 1>}, {pipeline_mode = #tpu.pipeline_mode<synchronous>, transform_indices = @transform_4, window_bounds = array<i64: 64, 32>}]} {
    %c0 = arith.constant 0 : index
    %c0_0 = arith.constant 0 : index
    %0 = vector.load %arg2[%c0, %c0_0] : memref<64x512xbf16, #tpu.memory_space<vmem>>, vector<64x512xbf16>
    %c0_1 = arith.constant 0 : index
    %c0_2 = arith.constant 0 : index
    %1 = vector.load %arg1[%c0_1, %c0_2] : memref<512x32xbf16, #tpu.memory_space<vmem>>, vector<512x32xbf16>
    %cst = arith.constant dense<0.000000e+00> : vector<64x32xf32>
    %2 = tpu.matmul %0, %1, %cst {dimension_numbers = #tpu.dot_dimension_numbers<[1], [0], [0], [1], [0, 0, 1, 1], [], []>} : vector<64x512xbf16>, vector<512x32xbf16>, vector<64x32xf32> -> vector<64x32xf32>
    %cst_3 = arith.constant dense<0.000000e+00> : vector<64xf32>
    %3 = vector.multi_reduction <add>, %2, %cst_3 [1] : vector<64x32xf32> to vector<64xf32>
    %4 = vector.shape_cast %3 : vector<64xf32> to vector<64x1xf32>
    %cst_4 = arith.constant 3.125000e-02 : f32
    %5 = vector.broadcast %cst_4 : f32 to vector<64x1xf32>
    %6 = arith.mulf %4, %5 : vector<64x1xf32>
    %7 = vector.broadcast %6 : vector<64x1xf32> to vector<64x32xf32>
    %8 = arith.subf %2, %7 : vector<64x32xf32>
    %9 = arith.mulf %8, %8 : vector<64x32xf32>
    %cst_5 = arith.constant dense<0.000000e+00> : vector<64xf32>
    %10 = vector.multi_reduction <add>, %9, %cst_5 [1] : vector<64x32xf32> to vector<64xf32>
    %11 = vector.shape_cast %10 : vector<64xf32> to vector<64x1xf32>
    %cst_6 = arith.constant 3.125000e-02 : f32
    %12 = vector.broadcast %cst_6 : f32 to vector<64x1xf32>
    %13 = arith.mulf %11, %12 : vector<64x1xf32>
    %c0_7 = arith.constant 0 : index
    %c0_8 = arith.constant 0 : index
    %14 = vector.load %arg3[%c0_7, %c0_8] : memref<64x1xf32, #tpu.memory_space<vmem>>, vector<64x1xf32>
    %cst_9 = arith.constant 9.99999974E-6 : f32
    %15 = vector.broadcast %cst_9 : f32 to vector<64x1xf32>
    %16 = arith.addf %13, %15 : vector<64x1xf32>
    %17 = math.rsqrt %16 : vector<64x1xf32>
    %18 = arith.mulf %14, %17 : vector<64x1xf32>
    %19 = vector.broadcast %18 : vector<64x1xf32> to vector<64x32xf32>
    %20 = arith.mulf %8, %19 : vector<64x32xf32>
    %c0_10 = arith.constant 0 : index
    %c0_11 = arith.constant 0 : index
    %21 = vector.load %arg4[%c0_10, %c0_11] : memref<64x1xf32, #tpu.memory_space<vmem>>, vector<64x1xf32>
    %22 = vector.broadcast %21 : vector<64x1xf32> to vector<64x32xf32>
    %23 = arith.addf %20, %22 : vector<64x32xf32>
    %cst_12 = arith.constant 0.000000e+00 : f32
    %24 = vector.broadcast %cst_12 : f32 to vector<64x32xf32>
    %25 = arith.cmpf oge, %23, %24 : vector<64x32xf32>
    %cst_13 = arith.constant 2.000000e-01 : f32
    %26 = vector.broadcast %cst_13 : f32 to vector<64x32xf32>
    %27 = arith.mulf %26, %23 : vector<64x32xf32>
    %28 = arith.select %25, %23, %27 : vector<64x32xi1>, vector<64x32xf32>
    %29 = arith.truncf %28 : vector<64x32xf32> to vector<64x32xbf16>
    %c0_14 = arith.constant 0 : index
    %c0_15 = arith.constant 0 : index
    %30 = vector.load %arg5[%c0_14, %c0_15] : memref<64x32xbf16, #tpu.memory_space<vmem>>, vector<64x32xbf16>
    tpu.vector_store %arg5[%c0_14, %c0_15], %29 {strides = array<i32>} : memref<64x32xbf16, #tpu.memory_space<vmem>>, vector<64x32xbf16>,
    return
  }
  func.func @transform_0(%arg0: i32) -> (i32, i32) {
    %c0_i32 = arith.constant 0 : i32
    %c0_i32_0 = arith.constant 0 : i32
    %c0_i32_1 = arith.constant 0 : i32
    return %c0_i32, %c0_i32_0 : i32, i32
  }
  func.func @transform_1(%arg0: i32) -> (i32, i32) {
    %c0_i32 = arith.constant 0 : i32
    %c0_i32_0 = arith.constant 0 : i32
    %c0_i32_1 = arith.constant 0 : i32
    return %c0_i32, %c0_i32_0 : i32, i32
  }
  func.func @transform_2(%arg0: i32) -> (i32, i32) {
    %c0_i32 = arith.constant 0 : i32
    %c0_i32_0 = arith.constant 0 : i32
    %c0_i32_1 = arith.constant 0 : i32
    return %c0_i32, %c0_i32_0 : i32, i32
  }
  func.func @transform_3(%arg0: i32) -> (i32, i32) {
    %c0_i32 = arith.constant 0 : i32
    %c0_i32_0 = arith.constant 0 : i32
    %c0_i32_1 = arith.constant 0 : i32
    return %c0_i32, %c0_i32_0 : i32, i32
  }
  func.func @transform_4(%arg0: i32) -> (i32, i32) {
    %c0_i32 = arith.constant 0 : i32
    %c0_i32_0 = arith.constant 0 : i32
    %c0_i32_1 = arith.constant 0 : i32
    return %c0_i32, %c0_i32_0 : i32, i32
  }
}

module attributes {stable_mosaic.version = 11 : i64} {
  func.func @_conv_act_kernel(%arg0: i32, %arg1: memref<1024x2xbf16, #tpu.memory_space<vmem>>, %arg2: memref<1x1024xbf16, #tpu.memory_space<vmem>>, %arg3: memref<1x1xf32, #tpu.memory_space<vmem>>, %arg4: memref<1x2xf32, #tpu.memory_space<vmem>>) attributes {dimension_semantics = [#tpu.dimension_semantics<arbitrary>], iteration_bounds = array<i64: 1>, scalar_prefetch = 0 : i64, scratch_operands = 0 : i64, tpu.core_type = #tpu.core_type<tc>, window_params = [{pipeline_mode = #tpu.pipeline_mode<synchronous>, transform_indices = @transform_0, window_bounds = array<i64: 1024, 2>}, {pipeline_mode = #tpu.pipeline_mode<synchronous>, transform_indices = @transform_1, window_bounds = array<i64: 1, 1024>}, {pipeline_mode = #tpu.pipeline_mode<synchronous>, transform_indices = @transform_2, window_bounds = array<i64: 1, 1>}, {pipeline_mode = #tpu.pipeline_mode<synchronous>, transform_indices = @transform_3, window_bounds = array<i64: 1, 2>}]} {
    %c0 = arith.constant 0 : index
    %c0_0 = arith.constant 0 : index
    %0 = vector.load %arg2[%c0, %c0_0] : memref<1x1024xbf16, #tpu.memory_space<vmem>>, vector<1x1024xbf16>
    %c0_1 = arith.constant 0 : index
    %c0_2 = arith.constant 0 : index
    %1 = vector.load %arg1[%c0_1, %c0_2] : memref<1024x2xbf16, #tpu.memory_space<vmem>>, vector<1024x2xbf16>
    %cst = arith.constant dense<0.000000e+00> : vector<1x2xf32>
    %2 = tpu.matmul %0, %1, %cst {dimension_numbers = #tpu.dot_dimension_numbers<[1], [0], [0], [1], [0, 0, 1, 1], [], []>} : vector<1x1024xbf16>, vector<1024x2xbf16>, vector<1x2xf32> -> vector<1x2xf32>
    %c0_3 = arith.constant 0 : index
    %c0_4 = arith.constant 0 : index
    %3 = vector.load %arg3[%c0_3, %c0_4] : memref<1x1xf32, #tpu.memory_space<vmem>>, vector<1x1xf32>
    %4 = vector.broadcast %3 : vector<1x1xf32> to vector<1x2xf32>
    %5 = arith.addf %2, %4 : vector<1x2xf32>
    %cst_5 = arith.constant 0.000000e+00 : f32
    %6 = vector.broadcast %cst_5 : f32 to vector<1x2xf32>
    %7 = arith.subf %6, %5 : vector<1x2xf32>
    %8 = math.exp %7 : vector<1x2xf32>
    %cst_6 = arith.constant 1.000000e+00 : f32
    %9 = vector.broadcast %cst_6 : f32 to vector<1x2xf32>
    %10 = arith.addf %9, %8 : vector<1x2xf32>
    %11 = tpu.reciprocal %10 {approx = true} : vector<1x2xf32> -> vector<1x2xf32>
    %c0_7 = arith.constant 0 : index
    %c0_8 = arith.constant 0 : index
    %12 = vector.load %arg4[%c0_7, %c0_8] : memref<1x2xf32, #tpu.memory_space<vmem>>, vector<1x2xf32>
    tpu.vector_store %arg4[%c0_7, %c0_8], %11 {strides = array<i32>} : memref<1x2xf32, #tpu.memory_space<vmem>>, vector<1x2xf32>,
    return
  }
  func.func @transform_0(%arg0: i32) -> (i32, i32) {
    %c0_i32 = arith.constant 0 : i32
    %c0_i32_0 = arith.constant 0 : i32
    %c0_i32_1 = arith.constant 0 : i32
    return %c0_i32, %c0_i32_0 : i32, i32
  }
  func.func @transform_1(%arg0: i32) -> (i32, i32) {
    %c0_i32 = arith.constant 0 : i32
    %c0_i32_0 = arith.constant 0 : i32
    %c0_i32_1 = arith.constant 0 : i32
    return %c0_i32, %c0_i32_0 : i32, i32
  }
  func.func @transform_2(%arg0: i32) -> (i32, i32) {
    %c0_i32 = arith.constant 0 : i32
    %c0_i32_0 = arith.constant 0 : i32
    %c0_i32_1 = arith.constant 0 : i32
    return %c0_i32, %c0_i32_0 : i32, i32
  }
  func.func @transform_3(%arg0: i32) -> (i32, i32) {
    %c0_i32 = arith.constant 0 : i32
    %c0_i32_0 = arith.constant 0 : i32
    %c0_i32_1 = arith.constant 0 : i32
    return %c0_i32, %c0_i32_0 : i32, i32
  }
}

</mosaic_0001>

<bundles_post_ra>
// kernel: discriminator_forward.5
= control target key start
LH: loop header
LB: loop body
LE: loop exit
PB: predicated region body
PF: predicated region fallthrough
CT: control target
= control target key end

     0   :  { %s497_s12 = smov 0   ;;  %s499_s13 = smov 0   ;;  %s555_s0 = inlined_call_operand.vmem [shape: bf16[48,2048], index: 0, kind: input, shape index: {}]   ;;  %s556_s1 = inlined_call_operand.vmem [shape: bf16[8,48], index: 1, kind: input, shape index: {}]   ;;  %s557_s2 = inlined_call_operand.vmem [shape: f32[8,1], index: 2, kind: input, shape index: {}]   ;;  %s558_s3 = inlined_call_operand.vmem [shape: bf16[8,2048], index: 3, kind: output, shape index: {}]  }
   0x1   :  { %s501_s14 = smov 0  }
   0x2 LB: > { %s394_s15 = sadd.s32 4294967295, %s474_s14   ;;  %s514_s16 = sadd.s32 1, %s474_s14   ;;  %s474_s14 = sphi %s501_s14, %s561_s14   ;;  %s470_s13 = sphi %s499_s13, %s560_s13   ;;  %s466_s12 = sphi %s497_s12, %s559_s12  }
   0x3   : > { %s17_s17 = ssub.s32 %s474_s14, %s514_s16  ;;  %s20_s18 = sadd.s32 1, %s470_s13 }
   0x4   : > { %p18_p0 = scmp.eq.s32.totalorder %s17_s17, 0  ;;  %p27_p1 = scmp.ne.s32.totalorder %s470_s13, %s466_s12 }
   0x5   : > { %p28_p2 = scmp.eq.s32.totalorder %s474_s14, 0  ;;  %p397_p4 = scmp.ge.s32.totalorder %s474_s14, 8 }
   0x6   : > { %s523_s19 = scalar_select %p18_p0, %s470_s13, %s20_s18  }
   0x7   : > { %p29_p3 = por %p28_p2, %p27_p1  ;;  %127 = sbr.rel (%p397_p4) target bundleno = 24 (0x18), region = 24 }
   0xe   : > { %130 = sbr.rel (!%p29_p3) target bundleno = 24 (0x18), region = 28  ;;  %s132_s20 = sand.u32 (%p29_p3), 1, %s470_s13  }
   0xf   : > { %s413_s21 = sshll.u32 (%p29_p3), %s474_s14, 3  ;;  %s415_s22 = smul.u32 (%p29_p3), 48, %s132_s20 }
  0x10   : > { %s137_s25 = scalar_lea.vmem (%p29_p3), %s555_s0, %s413_s21 }
  0x11   : > { %v175_v0 = vld [vmem:[%s137_s25] sm:$0xff] (%p29_p3)  ;;  %s134_s26 = scalar_lea.vmem (%p29_p3), [#allocation2], %s415_s22 }
  0x12   : > { %v177_v1 = vld [vmem:[%s137_s25 + $0x40] sm:$0xff] (%p29_p3)  ;;  %176 = vst [vmem:[%s134_s26] sm:$0xff] (%p29_p3), %v175_v0 }
  0x13   : > { %v179_v2 = vld [vmem:[%s137_s25 + $0x80] sm:$0xff] (%p29_p3)  ;;  %178 = vst [vmem:[%s134_s26 + $0x8] sm:$0xff] (%p29_p3), %v177_v1 }
  0x14   : > { %v181_v3 = vld [vmem:[%s137_s25 + $0xc0] sm:$0xff] (%p29_p3)  ;;  %180 = vst [vmem:[%s134_s26 + $0x10] sm:$0xff] (%p29_p3), %v179_v2 }
  0x15   : > { %v183_v4 = vld [vmem:[%s137_s25 + $0x100] sm:$0xff]  ;;  %182 = vst [vmem:[%s134_s26 + $0x18] sm:$0xff] %v181_v3 }
  0x16   : > { %v185_v5 = vld [vmem:[%s137_s25 + $0x140] sm:$0xff]  ;;  %184 = vst [vmem:[%s134_s26 + $0x20] sm:$0xff] %v183_v4 }
  0x17   : > { %186 = vst [vmem:[%s134_s26 + $0x28] sm:$0xff] %v185_v5 }
  0x18 PF: > { %p400_p5 = scmp.ge.s32.totalorder %s474_s14, 1  ;;  %p191_p6 = scmp.lt.s32.totalorder %s474_s14, 9 }
  0x1a   : > { %p192_p7 = pnand %p400_p5, %p191_p6 }
  0x1b   : > { %s198_s27 = sand.u32 (!%p192_p7), 1, %s466_s12   ;;  %v236_v6 = vld [vmem:[%s557_s2] sm:$0xff] (!%p192_p7)  ;;  %v476_v7 = vmov (!%p192_p7), 0   ;;  %vm272_vm0 = vcmask (!%p192_p7), 392192   ;;  %s401_s7 = sshll.u32 (!%p192_p7), %s394_s15, 1 }
  0x1c   : > { %195 = sbr.rel (%p192_p7) target bundleno = 266 (0x10a), region = 66  ;;  %308 = vmatprep.mubr.bf16.mxu0 (!%p192_p7), %v476_v7  ;;  %442 = vset.pattern.permute.xlu0 (!%p192_p7), %v476_v7  ;;  %v229_v14 = vld [vmem:[%s556_s1] sm:$0xf] (!%p192_p7)  ;;  %p223_p8 = scmp.lt.s32.totalorder (!%p192_p7), %s401_s7, 15 }
  0x1d   : > { %s416_s30 = smul.u32 (!%p192_p7), 48, %s198_s27  ;;  %239 = vperm.xlu0 (!%p192_p7), %442, %v236_v6  }
  0x1f   : > { %s200_s4 = scalar_lea.vmem (!%p192_p7), [#allocation2], %s416_s30 }
  0x20   : > { %v443_v8 = vld [vmem:[%s200_s4 + $0x4] ss:$8 sps:$4 sm:$0xff] (!%p192_p7)   ;;  %v445_v9 = vld [vmem:[%s200_s4] ss:$8 sps:$4 sm:$0xff] (!%p192_p7)   ;;  %v446_v10 = vld [vmem:[%s200_s4 + $0x14] ss:$8 sps:$4 sm:$0xff] (!%p192_p7)  }
  0x21   : > { %276 = vmatprep.subr.bf16.mxu0 (!%p192_p7), %v443_v8  ;;  %v448_v11 = vld [vmem:[%s200_s4 + $0x10] ss:$8 sps:$4 sm:$0xff] (!%p192_p7)   ;;  %v449_v12 = vld [vmem:[%s200_s4 + $0x24] ss:$8 sps:$4 sm:$0xff] (!%p192_p7)   ;;  %v451_v13 = vld [vmem:[%s200_s4 + $0x20] ss:$8 sps:$4 sm:$0xff] (!%p192_p7)  }
  0x22   : > { %277 = vmatpush1.bf16.msra.mxu0 (!%p192_p7), %v445_v9 }
  0x23   : > { %278 = vmatprep.subr.bf16.mxu0 %v446_v10  ;;  %s563_s7 = smov (!%p223_p8, %s401_s7), 15 }
  0x24   : > { %s402_s8 = sshll.u32 %s563_s7, 2 }
  0x25   : > { %s226_s11 = scalar_lea.vmem %s558_s3, %s402_s8 }
  0x26   : > { %279 = vmatpush1.bf16.msra.mxu0 %v448_v11 }
  0x27   : > { %280 = vmatprep.subr.bf16.mxu0 %v449_v12 }
  0x2a   : > { %281 = vmatpush1.bf16.msra.mxu0 %v451_v13 }
  0x2d   : > { %409 = vmatmul.mubr.msk.bf16.vlgmr.msra.gmra.mrb[0].mxu0 %vm272_vm0, %v229_v14 }
  0x9c   : > { %v240_v15 = vpop.permute.xlu0 %239 }
 0x100   : > { %v310_v16 = vpop.f32.mrb[0].mxu0 }
 0x101   : > { %v311_v17 = vadd.f32 %v310_v16, %v240_v15  ;;  %v312_v18 = vpop.f32.mrb[1].mxu0 }
 0x102   : > { %v313_v19 = vadd.f32 %v312_v18, %v240_v15  ;;  %v314_v20 = vpop.f32.mrb[2].mxu0 }
 0x103   : > { %vm317_vm1 = vcmp.ge.f32.partialorder %v311_v17, 0.0  ;;  %v319_v21 = vmul.f32 0.2, %v311_v17  ;;  %v315_v22 = vpop.f32.mrb[3].mxu0 }
 0x104   : > { %vm318_vm2 = vcmp.ge.f32.partialorder %v313_v19, 0.0  ;;  %v320_v23 = vmul.f32 0.2, %v313_v19 }
 0x105   : > { %v321_v24 = vsel %vm317_vm1, %v311_v17, %v319_v21 }
 0x106   : > { %v322_v25 = vsel %vm318_vm2, %v313_v19, %v320_v23 }
 0x107   : > { %v414_v26 = vpack.c.bf16 %v322_v25, %v321_v24 }
 0x109   : > { %331 = vst [vmem:[%s226_s11] sm:$0xff] %v414_v26 }
 0x10a PF: > { %p10_p9 = scmp.ge.s32.totalorder %s514_s16, 10   ;;  %s559_s12 = smov %s470_s13 }
 0x10b   : > { %s560_s13 = smov %s523_s19  ;;  %s561_s14 = smov %s514_s16 }
 0x10c   :  { %12 = sbr.rel (!%p10_p9) target bundleno = 2 (0x2), region = 105 }

// kernel: discriminator_forward.6
= control target key start
LH: loop header
LB: loop body
LE: loop exit
PB: predicated region body
PF: predicated region fallthrough
CT: control target
= control target key end

     0   :  { %v543_v1 = vmov 0   ;;  %s692_s0 = inlined_call_operand.vmem [shape: bf16[128,512], index: 0, kind: input, shape index: {}]   ;;  %s693_s1 = inlined_call_operand.vmem [shape: bf16[16,128], index: 1, kind: input, shape index: {}]   ;;  %s694_s3 = inlined_call_operand.vmem [shape: f32[16,1], index: 3, kind: input, shape index: {}]   ;;  %s695_s2 = inlined_call_operand.vmem [shape: f32[16,1], index: 2, kind: input, shape index: {}]   ;;  %s696_s4 = inlined_call_operand.vmem [shape: bf16[16,512], index: 4, kind: output, shape index: {}]  }
   0x1   :  { %v490_v0 = vld [vmem:[%s692_s0 + $0x4] ss:$16 sps:$4 sm:$0xff]   ;;  %250 = vmatprep.mubr.bf16.mxu0 %v543_v1  ;;  %293 = vmatprep.mubr.bf16.mxu1 %v543_v1  ;;  %v492_v2 = vld [vmem:[%s692_s0 + $0xc] ss:$16 sps:$4 sm:$0xff]   ;;  %v494_v3 = vld [vmem:[%s692_s0] ss:$16 sps:$4 sm:$0xff]  }
   0x2   :  { %489 = vset.pattern.permute.xlu1 %v543_v1  ;;  %488 = vset.pattern.permute.xlu0 %v543_v1  ;;  %v495_v4 = vld [vmem:[%s692_s0 + $0x8] ss:$16 sps:$4 sm:$0xff]   ;;  %v496_v5 = vld [vmem:[%s692_s0 + $0x24] ss:$16 sps:$4 sm:$0xff]   ;;  %v498_v6 = vld [vmem:[%s692_s0 + $0x2c] ss:$16 sps:$4 sm:$0xff]  }
   0x3   :  { %218 = vmatprep.subr.bf16.mxu0 %v490_v0  ;;  %261 = vmatprep.subr.bf16.mxu1 %v492_v2  ;;  %v500_v7 = vld [vmem:[%s692_s0 + $0x20] ss:$16 sps:$4 sm:$0xff]   ;;  %v501_v8 = vld [vmem:[%s692_s0 + $0x28] ss:$16 sps:$4 sm:$0xff]   ;;  %v502_v9 = vld [vmem:[%s692_s0 + $0x44] ss:$16 sps:$4 sm:$0xff]  }
   0x4   :  { %219 = vmatpush1.bf16.msra.mxu0 %v494_v3  ;;  %262 = vmatpush1.bf16.msra.mxu1 %v495_v4  ;;  %v504_v10 = vld [vmem:[%s692_s0 + $0x4c] ss:$16 sps:$4 sm:$0xff]   ;;  %v506_v11 = vld [vmem:[%s692_s0 + $0x40] ss:$16 sps:$4 sm:$0xff]   ;;  %v507_v12 = vld [vmem:[%s692_s0 + $0x48] ss:$16 sps:$4 sm:$0xff]  }
   0x5   :  { %220 = vmatprep.subr.bf16.mxu0 %v496_v5  ;;  %263 = vmatprep.subr.bf16.mxu1 %v498_v6  ;;  %v508_v13 = vld [vmem:[%s692_s0 + $0x64] ss:$16 sps:$4 sm:$0xff]   ;;  %v510_v14 = vld [vmem:[%s692_s0 + $0x6c] ss:$16 sps:$4 sm:$0xff]   ;;  %v512_v15 = vld [vmem:[%s692_s0 + $0x60] ss:$16 sps:$4 sm:$0xff]  }
   0x6   :  { %v513_v16 = vld [vmem:[%s692_s0 + $0x68] ss:$16 sps:$4 sm:$0xff]   ;;  %v514_v17 = vld [vmem:[%s692_s0 + $0x84] ss:$16 sps:$4 sm:$0xff]   ;;  %v516_v18 = vld [vmem:[%s692_s0 + $0x8c] ss:$16 sps:$4 sm:$0xff]  }
   0x7   :  { %v518_v19 = vld [vmem:[%s692_s0 + $0x80] ss:$16 sps:$4 sm:$0xff]   ;;  %v519_v20 = vld [vmem:[%s692_s0 + $0x88] ss:$16 sps:$4 sm:$0xff]   ;;  %v520_v21 = vld [vmem:[%s692_s0 + $0xa4] ss:$16 sps:$4 sm:$0xff]  }
   0x8   :  { %221 = vmatpush1.bf16.msra.mxu0 %v500_v7  ;;  %264 = vmatpush1.bf16.msra.mxu1 %v501_v8  ;;  %v522_v22 = vld [vmem:[%s692_s0 + $0xac] ss:$16 sps:$4 sm:$0xff]   ;;  %v524_v23 = vld [vmem:[%s692_s0 + $0xa0] ss:$16 sps:$4 sm:$0xff]   ;;  %v525_v24 = vld [vmem:[%s692_s0 + $0xa8] ss:$16 sps:$4 sm:$0xff]  }
   0x9   :  { %222 = vmatprep.subr.bf16.mxu0 %v502_v9  ;;  %265 = vmatprep.subr.bf16.mxu1 %v504_v10  ;;  %v526_v25 = vld [vmem:[%s692_s0 + $0xc4] ss:$16 sps:$4 sm:$0xff]   ;;  %v528_v26 = vld [vmem:[%s692_s0 + $0xcc] ss:$16 sps:$4 sm:$0xff]   ;;  %v530_v27 = vld [vmem:[%s692_s0 + $0xc0] ss:$16 sps:$4 sm:$0xff]  }
   0xa   :  { %v531_v28 = vld [vmem:[%s692_s0 + $0xc8] ss:$16 sps:$4 sm:$0xff]   ;;  %v532_v29 = vld [vmem:[%s692_s0 + $0xe4] ss:$16 sps:$4 sm:$0xff]   ;;  %v534_v30 = vld [vmem:[%s692_s0 + $0xec] ss:$16 sps:$4 sm:$0xff]  }
   0xb   :  { %v536_v31 = vld [vmem:[%s692_s0 + $0xe0] ss:$16 sps:$4 sm:$0xff]   ;;  %v537_v32 = vld [vmem:[%s692_s0 + $0xe8] ss:$16 sps:$4 sm:$0xff]  }
   0xc   :  { %223 = vmatpush1.bf16.msra.mxu0 %v506_v11  ;;  %266 = vmatpush1.bf16.msra.mxu1 %v507_v12  ;;  %v538_v33 = vld [vmem:[%s693_s1] sm:$0xff]  }
   0xd   :  { %224 = vmatprep.subr.bf16.mxu0 %v508_v13  ;;  %267 = vmatprep.subr.bf16.mxu1 %v510_v14  ;;  %v370_v10 = vld [vmem:[%s694_s3] sm:$0xff] }
  0x10   :  { %225 = vmatpush1.bf16.msra.mxu0 %v512_v15  ;;  %268 = vmatpush1.bf16.msra.mxu1 %v513_v16 }
  0x11   :  { %226 = vmatprep.subr.bf16.mxu0 %v514_v17  ;;  %269 = vmatprep.subr.bf16.mxu1 %v516_v18  ;;  %v344_v17 = vld [vmem:[%s695_s2] sm:$0xff] }
  0x14   :  { %227 = vmatpush1.bf16.msra.mxu0 %v518_v19  ;;  %270 = vmatpush1.bf16.msra.mxu1 %v519_v20  ;;  %v345_v20 = vld [vmem:[%s695_s2 + $0x8] sm:$0xff] }
  0x15   :  { %228 = vmatprep.subr.bf16.mxu0 %v520_v21  ;;  %271 = vmatprep.subr.bf16.mxu1 %v522_v22 }
  0x18   :  { %229 = vmatpush1.bf16.msra.mxu0 %v524_v23  ;;  %272 = vmatpush1.bf16.msra.mxu1 %v525_v24  ;;  %v371_v23 = vld [vmem:[%s694_s3 + $0x8] sm:$0xff] }
  0x19   :  { %230 = vmatprep.subr.bf16.mxu0 %v526_v25  ;;  %273 = vmatprep.subr.bf16.mxu1 %v528_v26 }
  0x1c   :  { %231 = vmatpush1.bf16.msra.mxu0 %v530_v27  ;;  %274 = vmatpush1.bf16.msra.mxu1 %v531_v28 }
  0x1d   :  { %232 = vmatprep.subr.bf16.mxu0 %v532_v29  ;;  %275 = vmatprep.subr.bf16.mxu1 %v534_v30 }
  0x20   :  { %233 = vmatpush1.bf16.msra.mxu0 %v536_v31  ;;  %276 = vmatpush1.bf16.msra.mxu1 %v537_v32 }
  0x23   :  { %251 = vmatmul.mubr.bf16.vlgmr.msra.gmra.mrb[0].mxu0 %v538_v33  ;;  %294 = vmatmul.mubr.bf16.vlgmr.msra.gmra.mrb[0].mxu1 %v538_v33 }
  0xf6   :  { %v252_v34 = vpop.f32.mrb[0].mxu0  ;;  %v295_v35 = vpop.f32.mrb[0].mxu1 }
  0xf7   :  { %v254_v36 = vpop.f32.mrb[1].mxu0  ;;  %v297_v37 = vpop.f32.mrb[1].mxu1 }
  0xf8   :  { %v304_v38 = vadd.f32 %v254_v36, %v252_v34  ;;  %v256_v39 = vpop.f32.mrb[2].mxu0  ;;  %v299_v40 = vpop.f32.mrb[2].mxu1 }
  0xf9   :  { %v258_v41 = vpop.f32.mrb[3].mxu0  ;;  %v301_v42 = vpop.f32.mrb[3].mxu1 }
  0xfa   :  { %v309_v43 = vadd.f32 %v258_v41, %v256_v39  ;;  %v305_v44 = vadd.f32 %v304_v38, %v295_v35 }
  0xfc   :  { %v310_v45 = vadd.f32 %v309_v43, %v299_v40  ;;  %v306_v46 = vadd.f32 %v305_v44, %v297_v37 }
  0xfe   :  { %v311_v47 = vadd.f32 %v310_v45, %v301_v42  ;;  %307 = vadd.xlane.f32.xlu0 %v306_v46 }
 0x102   :  { %312 = vadd.xlane.f32.xlu0 %v311_v47 }
 0x18b   :  { %v308_v48 = vpop.xlane.xlu0 %307 }
 0x18c   :  { %v314_v49 = vmul.f32 0.001953125, %v308_v48 }
 0x18e   :  { %v316_v50 = vsub.f32 %v252_v34, %v314_v49  ;;  %v317_v51 = vsub.f32 %v254_v36, %v314_v49  ;;  %v318_v52 = vsub.f32 %v295_v35, %v314_v49  ;;  %v319_v54 = vsub.f32 %v297_v37, %v314_v49 }
 0x18f   :  { %v313_v53 = vpop.xlane.xlu0 %312 }
 0x190   :  { %v315_v55 = vmul.f32 0.001953125, %v313_v53  ;;  %v324_v56 = vmul.f32 %v316_v50, %v316_v50  ;;  %v325_v57 = vmul.f32 %v317_v51, %v317_v51  ;;  %v326_v58 = vmul.f32 %v318_v52, %v318_v52 }
 0x191   :  { %v327_v63 = vmul.f32 %v319_v54, %v319_v54 }
 0x192   :  { %v320_v59 = vsub.f32 %v256_v39, %v315_v55  ;;  %v321_v60 = vsub.f32 %v258_v41, %v315_v55  ;;  %v332_v61 = vadd.f32 %v325_v57, %v324_v56  ;;  %v322_v62 = vsub.f32 %v299_v40, %v315_v55 }
 0x193   :  { %v323_v1 = vsub.f32 %v301_v42, %v315_v55 }
 0x194   :  { %v333_v0 = vadd.f32 %v332_v61, %v326_v58  ;;  %v328_v2 = vmul.f32 %v320_v59, %v320_v59  ;;  %v329_v3 = vmul.f32 %v321_v60, %v321_v60  ;;  %v330_v5 = vmul.f32 %v322_v62, %v322_v62 }
 0x195   :  { %v331_v7 = vmul.f32 %v323_v1, %v323_v1 }
 0x196   :  { %v334_v4 = vadd.f32 %v333_v0, %v327_v63  ;;  %v337_v6 = vadd.f32 %v329_v3, %v328_v2 }
 0x198   :  { %335 = vadd.xlane.f32.xlu1 %v334_v4  ;;  %v338_v8 = vadd.f32 %v337_v6, %v330_v5 }
 0x19a   :  { %v339_v9 = vadd.f32 %v338_v8, %v331_v7 }
 0x19c   :  { %340 = vadd.xlane.f32.xlu1 %v339_v9 }
 0x1ad   :  { %374 = vperm.xlu1 %489, %v370_v10  }
 0x225   :  { %v336_v11 = vpop.xlane.xlu1 %335 }
 0x226   :  { %v342_v12 = vmul.f32 0.001953125, %v336_v11 }
 0x228   :  { %v346_v13 = vadd.f32 1e-05, %v342_v12 }
 0x229   :  { %v341_v14 = vpop.xlane.xlu1 %340 }
 0x22a   :  { %539 = vrsqrt.f32 %v346_v13  ;;  %v343_v15 = vmul.f32 0.001953125, %v341_v14 }
 0x22c   :  { %v347_v16 = vadd.f32 1e-05, %v343_v15 }
 0x22d   :  { %v375_v24 = vpop.permute.xlu1 %374 }
 0x22e   :  { %541 = vrsqrt.f32 %v347_v16 }
 0x234   :  { %v540_v18 = vpop.eup %539 }
 0x235   :  { %v350_v19 = vmul.f32 %v540_v18, %v344_v17 }
 0x237   :  { %354 = vperm.xlu0 %488, %v350_v19  }
 0x238   :  { %v542_v21 = vpop.eup %541 }
 0x239   :  { %v351_v22 = vmul.f32 %v542_v21, %v345_v20 }
 0x23b   :  { %359 = vperm.xlu1 %489, %v351_v22  }
 0x23f   :  { %379 = vperm.xlu1 %489, %v371_v23  }
 0x2b6   :  { %v355_v25 = vpop.permute.xlu0 %354 }
 0x2b7   :  { %v362_v26 = vmul.f32 %v355_v25, %v316_v50  ;;  %v363_v27 = vmul.f32 %v355_v25, %v317_v51  ;;  %v364_v28 = vmul.f32 %v355_v25, %v318_v52  ;;  %v365_v29 = vmul.f32 %v355_v25, %v319_v54 }
 0x2b9   :  { %v382_v30 = vadd.f32 %v375_v24, %v362_v26  ;;  %v383_v31 = vadd.f32 %v375_v24, %v363_v27  ;;  %v384_v32 = vadd.f32 %v375_v24, %v364_v28  ;;  %v385_v33 = vadd.f32 %v375_v24, %v365_v29 }
 0x2ba   :  { %v360_v34 = vpop.permute.xlu1 %359 }
 0x2bb   :  { %vm390_vm0 = vcmp.ge.f32.partialorder %v382_v30, 0.0  ;;  %vm391_vm1 = vcmp.ge.f32.partialorder %v383_v31, 0.0  ;;  %vm392_vm2 = vcmp.ge.f32.partialorder %v384_v32, 0.0  ;;  %vm393_vm3 = vcmp.ge.f32.partialorder %v385_v33, 0.0 }
 0x2bc   :  { %v398_v35 = vmul.f32 0.2, %v382_v30  ;;  %v399_v36 = vmul.f32 0.2, %v383_v31  ;;  %v400_v37 = vmul.f32 0.2, %v384_v32  ;;  %v366_v39 = vmul.f32 %v360_v34, %v320_v59 }
 0x2bd   :  { %v401_v38 = vmul.f32 0.2, %v385_v33  ;;  %v367_v40 = vmul.f32 %v360_v34, %v321_v60  ;;  %v368_v41 = vmul.f32 %v360_v34, %v322_v62  ;;  %v369_v45 = vmul.f32 %v360_v34, %v323_v1 }
 0x2be   :  { %v406_v42 = vsel %vm390_vm0, %v382_v30, %v398_v35  ;;  %v407_v43 = vsel %vm391_vm1, %v383_v31, %v399_v36  ;;  %v408_v44 = vsel %vm392_vm2, %v384_v32, %v400_v37  ;;  %v380_v46 = vpop.permute.xlu1 %379 }
 0x2bf   :  { %v409_v47 = vsel %vm393_vm3, %v385_v33, %v401_v38  ;;  %v483_v48 = vpack.c.bf16 %v407_v43, %v406_v42  ;;  %v386_v49 = vadd.f32 %v380_v46, %v366_v39  ;;  %v387_v50 = vadd.f32 %v380_v46, %v367_v40 }
 0x2c0   :  { %v484_v51 = vpack.c.bf16 %v409_v47, %v408_v44  ;;  %v388_v52 = vadd.f32 %v380_v46, %v368_v41  ;;  %v389_v53 = vadd.f32 %v380_v46, %v369_v45 }
 0x2c1   :  { %438 = vst [vmem:[%s696_s4] sm:$0xff] %v483_v48  ;;  %vm394_vm4 = vcmp.ge.f32.partialorder %v386_v49, 0.0  ;;  %vm395_vm5 = vcmp.ge.f32.partialorder %v387_v50, 0.0  ;;  %v402_v54 = vmul.f32 0.2, %v386_v49  ;;  %v403_v55 = vmul.f32 0.2, %v387_v50 }
 0x2c2   :  { %439 = vst [vmem:[%s696_s4 + $0x8] sm:$0xff] %v484_v51  ;;  %vm396_vm6 = vcmp.ge.f32.partialorder %v388_v52, 0.0  ;;  %vm397_vm7 = vcmp.ge.f32.partialorder %v389_v53, 0.0  ;;  %v404_v56 = vmul.f32 0.2, %v388_v52 }
 0x2c3   :  { %v405_v57 = vmul.f32 0.2, %v389_v53  ;;  %v410_v58 = vsel %vm394_vm4, %v386_v49, %v402_v54  ;;  %v411_v59 = vsel %vm395_vm5, %v387_v50, %v403_v55 }
 0x2c4   :  { %v412_v60 = vsel %vm396_vm6, %v388_v52, %v404_v56  ;;  %v485_v62 = vpack.c.bf16 %v411_v59, %v410_v58 }
 0x2c5   :  { %v413_v61 = vsel %vm397_vm7, %v389_v53, %v405_v57 }
 0x2c6   :  { %v486_v63 = vpack.c.bf16 %v413_v61, %v412_v60  ;;  %440 = vst [vmem:[%s696_s4 + $0x10] sm:$0xff] %v485_v62 }
 0x2c8   :  { %441 = vst [vmem:[%s696_s4 + $0x18] sm:$0xff] %v486_v63 }

// kernel: discriminator_forward.7
= control target key start
LH: loop header
LB: loop body
LE: loop exit
PB: predicated region body
PF: predicated region fallthrough
CT: control target
= control target key end

     0   :  { %v471_v48 = vmov 0   ;;  %s607_s0 = inlined_call_operand.vmem [shape: bf16[256,128], index: 0, kind: input, shape index: {}]   ;;  %s608_s1 = inlined_call_operand.vmem [shape: bf16[32,256], index: 1, kind: input, shape index: {}]   ;;  %s609_s3 = inlined_call_operand.vmem [shape: f32[32,1], index: 3, kind: input, shape index: {}]   ;;  %s610_s2 = inlined_call_operand.vmem [shape: f32[32,1], index: 2, kind: input, shape index: {}]   ;;  %s611_s4 = inlined_call_operand.vmem [shape: bf16[32,128], index: 4, kind: output, shape index: {}]  }
   0x1   :  { %v441_v0 = vld [vmem:[%s607_s0 + $0x40] sm:$0xff]   ;;  %v443_v2 = vld [vmem:[%s607_s0 + $0x48] sm:$0xff]   ;;  %v445_v4 = vld [vmem:[%s607_s0 + $0x50] sm:$0xff]   ;;  %440 = vset.pattern.permute.xlu1 %v471_v48  ;;  %439 = vset.pattern.permute.xlu0 %v471_v48 }
   0x2   :  { %v442_v1 = vld [vmem:[%s607_s0] sm:$0xff]   ;;  %394 = vmatprep.subr.bf16.mxu0 %v441_v0  ;;  %422 = vmatprep.subr.bf16.mxu1 %v441_v0  ;;  %v444_v3 = vld [vmem:[%s607_s0 + $0x8] sm:$0xff]   ;;  %v446_v5 = vld [vmem:[%s607_s0 + $0x10] sm:$0xff]  }
   0x3   :  { %395 = vmatpush3.bf16.msra.mxu0 %v442_v1  ;;  %430 = vmatpush3.bf16.msra.mxu1 %v442_v1  ;;  %v447_v6 = vld [vmem:[%s607_s0 + $0x58] sm:$0xff]   ;;  %v449_v8 = vld [vmem:[%s607_s0 + $0x60] sm:$0xff]   ;;  %v451_v10 = vld [vmem:[%s607_s0 + $0x68] sm:$0xff]  }
   0x4   :  { %396 = vmatprep.subr.bf16.mxu0 %v443_v2  ;;  %423 = vmatprep.subr.bf16.mxu1 %v443_v2  ;;  %v448_v7 = vld [vmem:[%s607_s0 + $0x18] sm:$0xff]   ;;  %v450_v9 = vld [vmem:[%s607_s0 + $0x20] sm:$0xff]   ;;  %v452_v13 = vld [vmem:[%s607_s0 + $0x28] sm:$0xff]  }
   0x5   :  { %v459_v11 = vld [vmem:[%s608_s1 + $0x4] ss:$8 sps:$4 sm:$0xff]   ;;  %v462_v12 = vld [vmem:[%s608_s1 + $0x14] ss:$8 sps:$4 sm:$0xff]   ;;  %v457_v18 = vld [vmem:[%s608_s1] ss:$8 sps:$4 sm:$0xff]  }
   0x6   :  { %v453_v14 = vld [vmem:[%s607_s0 + $0x70] sm:$0xff]   ;;  %202 = vmatprep.mubr.bf16.mxu0 %v459_v11  ;;  %210 = vmatprep.mubr.bf16.mxu1 %v462_v12  ;;  %v455_v16 = vld [vmem:[%s607_s0 + $0x78] sm:$0xff]   ;;  %v291_v49 = vld [vmem:[%s609_s3] sm:$0xff] }
   0x7   :  { %397 = vmatpush3.bf16.msra.mxu0 %v444_v3  ;;  %431 = vmatpush3.bf16.msra.mxu1 %v444_v3  ;;  %v454_v15 = vld [vmem:[%s607_s0 + $0x30] sm:$0xff]   ;;  %v456_v17 = vld [vmem:[%s607_s0 + $0x38] sm:$0xff]   ;;  %v292_v50 = vld [vmem:[%s609_s3 + $0x8] sm:$0xff] }
   0x8   :  { %398 = vmatprep.subr.bf16.mxu0 %v445_v4  ;;  %424 = vmatprep.subr.bf16.mxu1 %v445_v4  ;;  %v460_v19 = vld [vmem:[%s608_s1 + $0x10] ss:$8 sps:$4 sm:$0xff]   ;;  %v251_v0 = vld [vmem:[%s610_s2] sm:$0xff] }
   0x9   :  { %v293_v51 = vld [vmem:[%s609_s3 + $0x10] sm:$0xff]  ;;  %v294_v12 = vld [vmem:[%s609_s3 + $0x18] sm:$0xff] }
   0xa   :  { %v253_v3 = vld [vmem:[%s610_s2 + $0x10] sm:$0xff] }
   0xb   :  { %399 = vmatpush3.bf16.msra.mxu0 %v446_v5  ;;  %432 = vmatpush3.bf16.msra.mxu1 %v446_v5 }
   0xc   :  { %400 = vmatprep.subr.bf16.mxu0 %v447_v6  ;;  %425 = vmatprep.subr.bf16.mxu1 %v447_v6 }
   0xf   :  { %401 = vmatpush3.bf16.msra.mxu0 %v448_v7  ;;  %433 = vmatpush3.bf16.msra.mxu1 %v448_v7  ;;  %v252_v7 = vld [vmem:[%s610_s2 + $0x8] sm:$0xff] }
  0x10   :  { %402 = vmatprep.subr.bf16.mxu0 %v449_v8  ;;  %426 = vmatprep.subr.bf16.mxu1 %v449_v8 }
  0x13   :  { %403 = vmatpush3.bf16.msra.mxu0 %v450_v9  ;;  %434 = vmatpush3.bf16.msra.mxu1 %v450_v9 }
  0x14   :  { %404 = vmatprep.subr.bf16.mxu0 %v451_v10  ;;  %427 = vmatprep.subr.bf16.mxu1 %v451_v10  ;;  %v254_v10 = vld [vmem:[%s610_s2 + $0x18] sm:$0xff] }
  0x17   :  { %405 = vmatpush3.bf16.msra.mxu0 %v452_v13  ;;  %435 = vmatpush3.bf16.msra.mxu1 %v452_v13 }
  0x18   :  { %406 = vmatprep.subr.bf16.mxu0 %v453_v14  ;;  %428 = vmatprep.subr.bf16.mxu1 %v453_v14 }
  0x1b   :  { %407 = vmatpush3.bf16.msra.mxu0 %v454_v15  ;;  %436 = vmatpush3.bf16.msra.mxu1 %v454_v15 }
  0x1c   :  { %408 = vmatprep.subr.bf16.mxu0 %v455_v16  ;;  %429 = vmatprep.subr.bf16.mxu1 %v455_v16 }
  0x1f   :  { %409 = vmatpush3.bf16.msra.mxu0 %v456_v17  ;;  %437 = vmatpush3.bf16.msra.mxu1 %v456_v17 }
  0x22   :  { %203 = vmatmul.mubr.bf16.vlgmr.msra.gmra.mrb[0].mxu0 %v457_v18  ;;  %211 = vmatmul.mubr.bf16.vlgmr.msra.gmra.mrb[0].mxu1 %v460_v19 }
  0xf5   :  { %v410_v20 = vpop.f32.mrb[0].mxu0  ;;  %v416_v21 = vpop.f32.mrb[0].mxu1 }
  0xf6   :  { %v411_v22 = vpop.f32.mrb[1].mxu0  ;;  %v417_v23 = vpop.f32.mrb[1].mxu1 }
  0xf7   :  { %v412_v24 = vadd.f32 %v411_v22, %v410_v20  ;;  %v418_v25 = vadd.f32 %v417_v23, %v416_v21  ;;  %v413_v26 = vpop.f32.mrb[2].mxu0  ;;  %v419_v27 = vpop.f32.mrb[2].mxu1 }
  0xf8   :  { %v414_v28 = vpop.f32.mrb[3].mxu0  ;;  %v420_v29 = vpop.f32.mrb[3].mxu1 }
  0xf9   :  { %v415_v30 = vadd.f32 %v414_v28, %v413_v26  ;;  %v421_v31 = vadd.f32 %v420_v29, %v419_v27  ;;  %223 = vadd.xlane.f32.xlu1 %v418_v25  ;;  %219 = vadd.xlane.f32.xlu0 %v412_v24 }
  0xfd   :  { %225 = vadd.xlane.f32.xlu1 %v421_v31  ;;  %221 = vadd.xlane.f32.xlu0 %v415_v30 }
 0x186   :  { %v224_v32 = vpop.xlane.xlu1 %223  ;;  %v220_v33 = vpop.xlane.xlu0 %219 }
 0x187   :  { %v229_v34 = vmul.f32 0.0078125, %v224_v32  ;;  %v227_v35 = vmul.f32 0.0078125, %v220_v33 }
 0x189   :  { %v557_v36 = vsub.f32 %v412_v24, %v227_v35  ;;  %v559_v39 = vsub.f32 %v418_v25, %v229_v34 }
 0x18a   :  { %v226_v37 = vpop.xlane.xlu1 %225  ;;  %v222_v38 = vpop.xlane.xlu0 %221 }
 0x18b   :  { %v230_v40 = vmul.f32 0.0078125, %v226_v37  ;;  %v228_v41 = vmul.f32 0.0078125, %v222_v38  ;;  %v235_v42 = vmul.f32 %v557_v36, %v557_v36  ;;  %v237_v45 = vmul.f32 %v559_v39, %v559_v39 }
 0x18d   :  { %v563_v43 = vsub.f32 %v415_v30, %v228_v41  ;;  %239 = vadd.xlane.f32.xlu0 %v235_v42  ;;  %v565_v44 = vsub.f32 %v421_v31, %v230_v40 }
 0x18f   :  { %v236_v46 = vmul.f32 %v563_v43, %v563_v43  ;;  %v238_v47 = vmul.f32 %v565_v44, %v565_v44 }
 0x191   :  { %243 = vadd.xlane.f32.xlu0 %v237_v45  ;;  %241 = vadd.xlane.f32.xlu1 %v236_v46 }
 0x195   :  { %245 = vadd.xlane.f32.xlu1 %v238_v47 }
 0x1a6   :  { %297 = vperm.xlu1 %440, %v291_v49  }
 0x1aa   :  { %302 = vperm.xlu1 %440, %v292_v50  }
 0x1ae   :  { %307 = vperm.xlu1 %440, %v293_v51  }
 0x21a   :  { %v240_v52 = vpop.xlane.xlu0 %239 }
 0x21b   :  { %v247_v53 = vmul.f32 0.0078125, %v240_v52 }
 0x21d   :  { %v255_v54 = vadd.f32 1e-05, %v247_v53 }
 0x21e   :  { %v242_v55 = vpop.xlane.xlu1 %241  ;;  %v244_v56 = vpop.xlane.xlu0 %243 }
 0x21f   :  { %463 = vrsqrt.f32 %v255_v54  ;;  %v248_v57 = vmul.f32 0.0078125, %v242_v55  ;;  %v249_v58 = vmul.f32 0.0078125, %v244_v56 }
 0x221   :  { %v257_v59 = vadd.f32 1e-05, %v249_v58  ;;  %v256_v60 = vadd.f32 1e-05, %v248_v57 }
 0x222   :  { %v246_v61 = vpop.xlane.xlu1 %245 }
 0x223   :  { %v250_v62 = vmul.f32 0.0078125, %v246_v61  ;;  %465 = vrsqrt.f32 %v257_v59 }
 0x224   :  { %467 = vrsqrt.f32 %v256_v60 }
 0x225   :  { %v258_v63 = vadd.f32 1e-05, %v250_v62 }
 0x226   :  { %v298_v13 = vpop.permute.xlu1 %297 }
 0x227   :  { %469 = vrsqrt.f32 %v258_v63 }
 0x229   :  { %v464_v1 = vpop.eup %463 }
 0x22a   :  { %v263_v2 = vmul.f32 %v464_v1, %v251_v0  ;;  %v303_v14 = vpop.permute.xlu1 %302 }
 0x22c   :  { %269 = vperm.xlu0 %439, %v263_v2  }
 0x22d   :  { %v466_v4 = vpop.eup %465 }
 0x22e   :  { %v265_v5 = vmul.f32 %v466_v4, %v253_v3  ;;  %v468_v6 = vpop.eup %467  ;;  %v308_v15 = vpop.permute.xlu1 %307 }
 0x22f   :  { %v264_v8 = vmul.f32 %v468_v6, %v252_v7 }
 0x230   :  { %279 = vperm.xlu1 %440, %v265_v5  }
 0x231   :  { %v470_v9 = vpop.eup %469 }
 0x232   :  { %v266_v11 = vmul.f32 %v470_v9, %v254_v10 }
 0x234   :  { %274 = vperm.xlu1 %440, %v264_v8  }
 0x238   :  { %284 = vperm.xlu1 %440, %v266_v11  }
 0x23c   :  { %312 = vperm.xlu1 %440, %v294_v12  }
 0x2ab   :  { %v270_v16 = vpop.permute.xlu0 %269 }
 0x2ac   :  { %v287_v17 = vmul.f32 %v270_v16, %v557_v36 }
 0x2ae   :  { %v315_v19 = vadd.f32 %v298_v13, %v287_v17 }
 0x2af   :  { %v280_v18 = vpop.permute.xlu1 %279 }
 0x2b0   :  { %v289_v21 = vmul.f32 %v280_v18, %v559_v39  ;;  %v323_v23 = vmul.f32 0.2, %v315_v19  ;;  %vm319_vm0 = vcmp.ge.f32.partialorder %v315_v19, 0.0 }
 0x2b2   :  { %v317_v26 = vadd.f32 %v308_v15, %v289_v21  ;;  %v327_v28 = vsel %vm319_vm0, %v315_v19, %v323_v23 }
 0x2b3   :  { %v275_v20 = vpop.permute.xlu1 %274 }
 0x2b4   :  { %v288_v22 = vmul.f32 %v275_v20, %v563_v43  ;;  %v325_v33 = vmul.f32 0.2, %v317_v26  ;;  %vm321_vm2 = vcmp.ge.f32.partialorder %v317_v26, 0.0 }
 0x2b6   :  { %v316_v24 = vadd.f32 %v303_v14, %v288_v22  ;;  %v329_v36 = vsel %vm321_vm2, %v317_v26, %v325_v33 }
 0x2b7   :  { %v285_v25 = vpop.permute.xlu1 %284 }
 0x2b8   :  { %vm320_vm1 = vcmp.ge.f32.partialorder %v316_v24, 0.0  ;;  %v324_v27 = vmul.f32 0.2, %v316_v24  ;;  %v290_v30 = vmul.f32 %v285_v25, %v565_v44 }
 0x2ba   :  { %v328_v29 = vsel %vm320_vm1, %v316_v24, %v324_v27 }
 0x2bb   :  { %v386_v31 = vpack.c.bf16 %v328_v29, %v327_v28  ;;  %v313_v32 = vpop.permute.xlu1 %312 }
 0x2bc   :  { %v318_v34 = vadd.f32 %v313_v32, %v290_v30 }
 0x2bd   :  { %387 = vst [vmem:[%s611_s4] sm:$0xff] %v386_v31  }
 0x2be   :  { %vm322_vm3 = vcmp.ge.f32.partialorder %v318_v34, 0.0  ;;  %v326_v35 = vmul.f32 0.2, %v318_v34 }
 0x2c0   :  { %v330_v37 = vsel %vm322_vm3, %v318_v34, %v326_v35 }
 0x2c1   :  { %v391_v38 = vpack.c.bf16 %v330_v37, %v329_v36 }
 0x2c3   :  { %393 = vst [vmem:[%s611_s4 + $0x8] sm:$0xff] %v391_v38  }

// kernel: discriminator_forward.8
= control target key start
LH: loop header
LB: loop body
LE: loop exit
PB: predicated region body
PF: predicated region fallthrough
CT: control target
= control target key end

     0   :  { %vm500_vm0 = vcmask 261120   ;;  %vm773_vm2 = vcmask 257024   ;;  %s1315_s0 = inlined_call_operand.vmem [shape: bf16[512,32], index: 0, kind: input, shape index: {}]   ;;  %s1316_s1 = inlined_call_operand.vmem [shape: bf16[64,512], index: 1, kind: input, shape index: {}]   ;;  %s1317_s3 = inlined_call_operand.vmem [shape: f32[64,1], index: 3, kind: input, shape index: {}]   ;;  %s1318_s2 = inlined_call_operand.vmem [shape: f32[64,1], index: 2, kind: input, shape index: {}]   ;;  %s1319_s4 = inlined_call_operand.vmem [shape: bf16[64,32], index: 4, kind: output, shape index: {}]  }
   0x1   :  { %v933_v0 = vld [vmem:[%s1315_s0 + $0x40] sm:$0xff]   ;;  %v937_v4 = vld [vmem:[%s1315_s0 + $0x48] sm:$0xff]   ;;  %v941_v8 = vld [vmem:[%s1315_s0 + $0x50] sm:$0xff]  }
   0x2   :  { %v934_v1 = vld [vmem:[%s1315_s0 + $0xc0] sm:$0xff]   ;;  %850 = vmatprep.subr.bf16.mxu0 %v933_v0  ;;  %v938_v5 = vld [vmem:[%s1315_s0 + $0xc8] sm:$0xff]   ;;  %v942_v9 = vld [vmem:[%s1315_s0 + $0xd0] sm:$0xff]  }
   0x3   :  { %v935_v2 = vld [vmem:[%s1315_s0] sm:$0xff]   ;;  %890 = vmatprep.subr.bf16.mxu1 %v934_v1  ;;  %v939_v6 = vld [vmem:[%s1315_s0 + $0x8] sm:$0xff]   ;;  %v943_v10 = vld [vmem:[%s1315_s0 + $0x10] sm:$0xff]  }
   0x4   :  { %v936_v3 = vld [vmem:[%s1315_s0 + $0x80] sm:$0xff]   ;;  %851 = vmatpush3.bf16.msra.mxu0 %v935_v2  ;;  %v940_v7 = vld [vmem:[%s1315_s0 + $0x88] sm:$0xff]   ;;  %v944_v11 = vld [vmem:[%s1315_s0 + $0x90] sm:$0xff]  }
   0x5   :  { %891 = vmatpush3.bf16.msra.mxu1 %v936_v3  ;;  %852 = vmatprep.subr.bf16.mxu0 %v937_v4  ;;  %v945_v12 = vld [vmem:[%s1315_s0 + $0x58] sm:$0xff]   ;;  %v949_v16 = vld [vmem:[%s1315_s0 + $0x60] sm:$0xff]   ;;  %v953_v20 = vld [vmem:[%s1315_s0 + $0x68] sm:$0xff]  }
   0x6   :  { %892 = vmatprep.subr.bf16.mxu1 %v938_v5  ;;  %v946_v13 = vld [vmem:[%s1315_s0 + $0xd8] sm:$0xff]   ;;  %v950_v17 = vld [vmem:[%s1315_s0 + $0xe0] sm:$0xff]   ;;  %v954_v21 = vld [vmem:[%s1315_s0 + $0xe8] sm:$0xff]  }
   0x7   :  { %v947_v14 = vld [vmem:[%s1315_s0 + $0x18] sm:$0xff]   ;;  %v951_v18 = vld [vmem:[%s1315_s0 + $0x20] sm:$0xff]   ;;  %v955_v22 = vld [vmem:[%s1315_s0 + $0x28] sm:$0xff]  }
   0x8   :  { %853 = vmatpush3.bf16.msra.mxu0 %v939_v6  ;;  %v948_v15 = vld [vmem:[%s1315_s0 + $0x98] sm:$0xff]   ;;  %v952_v19 = vld [vmem:[%s1315_s0 + $0xa0] sm:$0xff]   ;;  %v956_v23 = vld [vmem:[%s1315_s0 + $0xa8] sm:$0xff]  }
   0x9   :  { %893 = vmatpush3.bf16.msra.mxu1 %v940_v7  ;;  %854 = vmatprep.subr.bf16.mxu0 %v941_v8  ;;  %v957_v24 = vld [vmem:[%s1315_s0 + $0x70] sm:$0xff]   ;;  %v961_v28 = vld [vmem:[%s1315_s0 + $0x78] sm:$0xff]  }
   0xa   :  { %894 = vmatprep.subr.bf16.mxu1 %v942_v9  ;;  %v958_v25 = vld [vmem:[%s1315_s0 + $0xf0] sm:$0xff]   ;;  %v962_v29 = vld [vmem:[%s1315_s0 + $0xf8] sm:$0xff]  }
   0xb   :  { %v959_v26 = vld [vmem:[%s1315_s0 + $0x30] sm:$0xff]   ;;  %v963_v30 = vld [vmem:[%s1315_s0 + $0x38] sm:$0xff]  }
   0xc   :  { %855 = vmatpush3.bf16.msra.mxu0 %v943_v10  ;;  %v960_v27 = vld [vmem:[%s1315_s0 + $0xb0] sm:$0xff]   ;;  %v964_v31 = vld [vmem:[%s1315_s0 + $0xb8] sm:$0xff]  }
   0xd   :  { %895 = vmatpush3.bf16.msra.mxu1 %v944_v11  ;;  %856 = vmatprep.subr.bf16.mxu0 %v945_v12  ;;  %v965_v32 = vld [vmem:[%s1316_s1] ss:$16 sps:$4 sm:$0xff]   ;;  %v967_v33 = vld [vmem:[%s1316_s1 + $0x4] ss:$16 sps:$4 sm:$0xff]   ;;  %v968_v34 = vld [vmem:[%s1316_s1 + $0x8] ss:$16 sps:$4 sm:$0xff]  }
   0xe   :  { %896 = vmatprep.subr.bf16.mxu1 %v946_v13  ;;  %v970_v35 = vld [vmem:[%s1316_s1 + $0xc] ss:$16 sps:$4 sm:$0xff]   ;;  %402 = vmatprep.mubr.bf16.mxu0 %v967_v33  ;;  %v971_v36 = vld [vmem:[%s1316_s1 + $0x24] ss:$16 sps:$4 sm:$0xff]   ;;  %v975_v38 = vld [vmem:[%s1316_s1 + $0x20] ss:$16 sps:$4 sm:$0xff]  }
   0xf   :  { %467 = vmatprep.mubr.bf16.mxu1 %v970_v35  ;;  %v973_v37 = vld [vmem:[%s1316_s1 + $0x2c] ss:$16 sps:$4 sm:$0xff]   ;;  %v976_v39 = vld [vmem:[%s1316_s1 + $0x28] ss:$16 sps:$4 sm:$0xff]   ;;  %v977_v40 = vld [vmem:[%s1316_s1 + $0x44] ss:$16 sps:$4 sm:$0xff]  }
  0x10   :  { %857 = vmatpush3.bf16.msra.mxu0 %v947_v14  ;;  %v979_v41 = vld [vmem:[%s1316_s1 + $0x4c] ss:$16 sps:$4 sm:$0xff]   ;;  %v981_v42 = vld [vmem:[%s1316_s1 + $0x40] ss:$16 sps:$4 sm:$0xff]   ;;  %v982_v43 = vld [vmem:[%s1316_s1 + $0x48] ss:$16 sps:$4 sm:$0xff]  }
  0x11   :  { %897 = vmatpush3.bf16.msra.mxu1 %v948_v15  ;;  %858 = vmatprep.subr.bf16.mxu0 %v949_v16  ;;  %v983_v44 = vld [vmem:[%s1316_s1 + $0x64] ss:$16 sps:$4 sm:$0xff]   ;;  %v985_v45 = vld [vmem:[%s1316_s1 + $0x6c] ss:$16 sps:$4 sm:$0xff]   ;;  %v987_v46 = vld [vmem:[%s1316_s1 + $0x60] ss:$16 sps:$4 sm:$0xff]  }
  0x12   :  { %898 = vmatprep.subr.bf16.mxu1 %v950_v17  ;;  %v988_v47 = vld [vmem:[%s1316_s1 + $0x68] ss:$16 sps:$4 sm:$0xff]  }
  0x14   :  { %859 = vmatpush3.bf16.msra.mxu0 %v951_v18 }
  0x15   :  { %899 = vmatpush3.bf16.msra.mxu1 %v952_v19  ;;  %860 = vmatprep.subr.bf16.mxu0 %v953_v20 }
  0x16   :  { %900 = vmatprep.subr.bf16.mxu1 %v954_v21 }
  0x18   :  { %861 = vmatpush3.bf16.msra.mxu0 %v955_v22 }
  0x19   :  { %901 = vmatpush3.bf16.msra.mxu1 %v956_v23  ;;  %862 = vmatprep.subr.bf16.mxu0 %v957_v24 }
  0x1a   :  { %902 = vmatprep.subr.bf16.mxu1 %v958_v25 }
  0x1c   :  { %863 = vmatpush3.bf16.msra.mxu0 %v959_v26 }
  0x1d   :  { %903 = vmatpush3.bf16.msra.mxu1 %v960_v27  ;;  %864 = vmatprep.subr.bf16.mxu0 %v961_v28 }
  0x1e   :  { %904 = vmatprep.subr.bf16.mxu1 %v962_v29 }
  0x20   :  { %865 = vmatpush3.bf16.msra.mxu0 %v963_v30 }
  0x21   :  { %905 = vmatpush3.bf16.msra.mxu1 %v964_v31 }
  0x23   :  { %403 = vmatmul.mubr.bf16.vlgmr.msra.gmra.mrb[0].mxu0 %v965_v32 }
  0x24   :  { %468 = vmatmul.mubr.bf16.vlgmr.msra.gmra.mrb[0].mxu1 %v968_v34  ;;  %410 = vmatprep.mubr.bf16.mxu0 %v971_v36 }
  0x25   :  { %475 = vmatprep.mubr.bf16.mxu1 %v973_v37 }
  0x2b   :  { %411 = vmatmul.mubr.bf16.gmra.mrb[4].mxu0 %v975_v38 }
  0x2c   :  { %476 = vmatmul.mubr.bf16.gmra.mrb[4].mxu1 %v976_v39  ;;  %418 = vmatprep.mubr.bf16.mxu0 %v977_v40 }
  0x2d   :  { %483 = vmatprep.mubr.bf16.mxu1 %v979_v41 }
  0x33   :  { %419 = vmatmul.mubr.bf16.gmra.mrb[8].mxu0 %v981_v42 }
  0x34   :  { %484 = vmatmul.mubr.bf16.gmra.mrb[8].mxu1 %v982_v43  ;;  %426 = vmatprep.mubr.bf16.mxu0 %v983_v44 }
  0x35   :  { %491 = vmatprep.mubr.bf16.mxu1 %v985_v45 }
  0x3b   :  { %427 = vmatmul.mubr.bf16.gmra.mrb[12].mxu0 %v987_v46 }
  0x3c   :  { %492 = vmatmul.mubr.bf16.gmra.mrb[12].mxu1 %v988_v47 }
  0xf6   :  { %v866_v48 = vpop.f32.mrb[0].mxu0 }
  0xf7   :  { %v906_v49 = vpop.f32.mrb[0].mxu1  ;;  %v867_v50 = vpop.f32.mrb[1].mxu0 }
  0xf8   :  { %v868_v51 = vadd.f32 %v867_v50, %v866_v48  ;;  %v907_v52 = vpop.f32.mrb[1].mxu1  ;;  %v869_v53 = vpop.f32.mrb[2].mxu0 }
  0xf9   :  { %v908_v54 = vadd.f32 %v907_v52, %v906_v49  ;;  %v909_v55 = vpop.f32.mrb[2].mxu1  ;;  %v870_v56 = vpop.f32.mrb[3].mxu0 }
  0xfa   :  { %v871_v57 = vadd.f32 %v870_v56, %v869_v53  ;;  %v910_v58 = vpop.f32.mrb[3].mxu1 }
  0xfb   :  { %v911_v59 = vadd.f32 %v910_v58, %v909_v55  ;;  %v470_v60 = vadd.f32 %v908_v54, %v868_v51 }
  0xfd   :  { %v501_v61 = vsel %vm500_vm0, %v470_v60, 0.0  ;;  %v1176_v62 = vadd.f32 %v911_v59, %v871_v57 }
  0xfe   :  { %502 = vadd.xlane.f32.xlu0 %v501_v61  ;;  %v872_v63 = vpop.f32.mrb[4].mxu0 }
  0xff   :  { %v912_v0 = vpop.f32.mrb[4].mxu1  ;;  %v873_v1 = vpop.f32.mrb[5].mxu0  ;;  %v504_v8 = vsel %vm500_vm0, %v1176_v62, 0.0 }
 0x100   :  { %v874_v2 = vadd.f32 %v873_v1, %v872_v63  ;;  %v913_v3 = vpop.f32.mrb[5].mxu1  ;;  %v875_v4 = vpop.f32.mrb[6].mxu0 }
 0x101   :  { %v914_v5 = vadd.f32 %v913_v3, %v912_v0  ;;  %v915_v6 = vpop.f32.mrb[6].mxu1  ;;  %v876_v7 = vpop.f32.mrb[7].mxu0 }
 0x102   :  { %v877_v9 = vadd.f32 %v876_v7, %v875_v4  ;;  %v916_v10 = vpop.f32.mrb[7].mxu1  ;;  %505 = vadd.xlane.f32.xlu0 %v504_v8 }
 0x103   :  { %v917_v11 = vadd.f32 %v916_v10, %v915_v6  ;;  %v478_v12 = vadd.f32 %v914_v5, %v874_v2 }
 0x105   :  { %v507_v13 = vsel %vm500_vm0, %v478_v12, 0.0  ;;  %v481_v14 = vadd.f32 %v917_v11, %v877_v9  ;;  %v1005_v11 = vmov 0  }
 0x106   :  { %508 = vadd.xlane.f32.xlu1 %v507_v13  ;;  %v878_v15 = vpop.f32.mrb[8].mxu0  ;;  %932 = vset.pattern.permute.xlu0 %v1005_v11 }
 0x107   :  { %v918_v16 = vpop.f32.mrb[8].mxu1  ;;  %v879_v17 = vpop.f32.mrb[9].mxu0  ;;  %v510_v24 = vsel %vm500_vm0, %v481_v14, 0.0  ;;  %931 = vset.pattern.permute.xlu1 %v1005_v11 }
 0x108   :  { %v880_v18 = vadd.f32 %v879_v17, %v878_v15  ;;  %v919_v19 = vpop.f32.mrb[9].mxu1  ;;  %v881_v20 = vpop.f32.mrb[10].mxu0 }
 0x109   :  { %v920_v21 = vadd.f32 %v919_v19, %v918_v16  ;;  %v921_v22 = vpop.f32.mrb[10].mxu1  ;;  %v882_v23 = vpop.f32.mrb[11].mxu0 }
 0x10a   :  { %v883_v25 = vadd.f32 %v882_v23, %v881_v20  ;;  %v922_v26 = vpop.f32.mrb[11].mxu1  ;;  %511 = vadd.xlane.f32.xlu1 %v510_v24 }
 0x10b   :  { %v923_v27 = vadd.f32 %v922_v26, %v921_v22  ;;  %v486_v28 = vadd.f32 %v920_v21, %v880_v18  ;;  %v662_v26 = vld [vmem:[%s1317_s3 + $0x8] sm:$0xff] }
 0x10d   :  { %v513_v29 = vsel %vm500_vm0, %v486_v28, 0.0  ;;  %v489_v30 = vadd.f32 %v923_v27, %v883_v25  ;;  %v661_v25 = vld [vmem:[%s1317_s3] sm:$0xff]  ;;  %v663_v27 = vld [vmem:[%s1317_s3 + $0x10] sm:$0xff] }
 0x10e   :  { %514 = vadd.xlane.f32.xlu0 %v513_v29  ;;  %v884_v31 = vpop.f32.mrb[12].mxu0  ;;  %v665_v29 = vld [vmem:[%s1317_s3 + $0x20] sm:$0xff] }
 0x10f   :  { %v924_v32 = vpop.f32.mrb[12].mxu1  ;;  %v885_v33 = vpop.f32.mrb[13].mxu0  ;;  %v516_v34 = vsel %vm500_vm0, %v489_v30, 0.0 }
 0x110   :  { %v886_v35 = vadd.f32 %v885_v33, %v884_v31  ;;  %v925_v36 = vpop.f32.mrb[13].mxu1  ;;  %517 = vadd.xlane.f32.xlu1 %v516_v34  ;;  %v887_v37 = vpop.f32.mrb[14].mxu0 }
 0x111   :  { %v926_v38 = vadd.f32 %v925_v36, %v924_v32  ;;  %v927_v39 = vpop.f32.mrb[14].mxu1  ;;  %v888_v40 = vpop.f32.mrb[15].mxu0 }
 0x112   :  { %v889_v41 = vadd.f32 %v888_v40, %v887_v37  ;;  %v928_v42 = vpop.f32.mrb[15].mxu1 }
 0x113   :  { %v929_v43 = vadd.f32 %v928_v42, %v927_v39  ;;  %v494_v44 = vadd.f32 %v926_v38, %v886_v35  ;;  %v581_v42 = vld [vmem:[%s1318_s2] sm:$0xff] }
 0x115   :  { %v519_v45 = vsel %vm500_vm0, %v494_v44, 0.0  ;;  %v497_v46 = vadd.f32 %v929_v43, %v889_v41 }
 0x116   :  { %520 = vadd.xlane.f32.xlu0 %v519_v45 }
 0x117   :  { %v522_v47 = vsel %vm500_vm0, %v497_v46, 0.0 }
 0x118   :  { %523 = vadd.xlane.f32.xlu1 %v522_v47 }
 0x18b   :  { %v503_v48 = vpop.xlane.xlu0 %502 }
 0x18c   :  { %v525_v49 = vmul.f32 0.03125, %v503_v48  ;;  %v582_v48 = vld [vmem:[%s1318_s2 + $0x8] sm:$0xff] }
 0x18e   :  { %v1186_v50 = vsub.f32 %v470_v60, %v525_v49 }
 0x18f   :  { %v506_v51 = vpop.xlane.xlu0 %505 }
 0x190   :  { %v526_v52 = vmul.f32 0.03125, %v506_v51  ;;  %v541_v53 = vmul.f32 %v1186_v50, %v1186_v50 }
 0x192   :  { %v1191_v54 = vsub.f32 %v1176_v62, %v526_v52  ;;  %v549_v55 = vsel %vm500_vm0, %v541_v53, 0.0 }
 0x193   :  { %v509_v56 = vpop.xlane.xlu1 %508  ;;  %550 = vadd.xlane.f32.xlu0 %v549_v55  ;;  %v668_v55 = vld [vmem:[%s1317_s3 + $0x38] sm:$0xff] }
 0x194   :  { %v527_v57 = vmul.f32 0.03125, %v509_v56  ;;  %v542_v58 = vmul.f32 %v1191_v54, %v1191_v54 }
 0x196   :  { %v1196_v59 = vsub.f32 %v478_v12, %v527_v57  ;;  %v552_v60 = vsel %vm500_vm0, %v542_v58, 0.0  ;;  %v583_v58 = vld [vmem:[%s1318_s2 + $0x10] sm:$0xff] }
 0x197   :  { %v512_v61 = vpop.xlane.xlu1 %511  ;;  %553 = vadd.xlane.f32.xlu1 %v552_v60 }
 0x198   :  { %v528_v63 = vmul.f32 0.03125, %v512_v61  ;;  %v543_v0 = vmul.f32 %v1196_v59, %v1196_v59 }
 0x19a   :  { %v1201_v62 = vsub.f32 %v481_v14, %v528_v63  ;;  %v555_v1 = vsel %vm500_vm0, %v543_v0, 0.0 }
 0x19b   :  { %556 = vadd.xlane.f32.xlu0 %v555_v1  ;;  %v515_v2 = vpop.xlane.xlu0 %514  ;;  %v584_v1 = vld [vmem:[%s1318_s2 + $0x18] sm:$0xff] }
 0x19c   :  { %v529_v3 = vmul.f32 0.03125, %v515_v2  ;;  %v544_v4 = vmul.f32 %v1201_v62, %v1201_v62 }
 0x19d   :  { %v518_v5 = vpop.xlane.xlu1 %517 }
 0x19e   :  { %v1206_v6 = vsub.f32 %v486_v28, %v529_v3  ;;  %v530_v7 = vmul.f32 0.03125, %v518_v5  ;;  %v558_v8 = vsel %vm500_vm0, %v544_v4, 0.0  ;;  %v664_v28 = vld [vmem:[%s1317_s3 + $0x18] sm:$0xff] }
 0x19f   :  { %559 = vadd.xlane.f32.xlu1 %v558_v8 }
 0x1a0   :  { %v1209_v9 = vsub.f32 %v489_v30, %v530_v7  ;;  %v545_v10 = vmul.f32 %v1206_v6, %v1206_v6  ;;  %v666_v30 = vld [vmem:[%s1317_s3 + $0x28] sm:$0xff] }
 0x1a2   :  { %v561_v12 = vsel %vm500_vm0, %v545_v10, 0.0  ;;  %v546_v13 = vmul.f32 %v1209_v9, %v1209_v9  ;;  %v585_v10 = vld [vmem:[%s1318_s2 + $0x20] sm:$0xff] }
 0x1a3   :  { %562 = vadd.xlane.f32.xlu0 %v561_v12  ;;  %v521_v14 = vpop.xlane.xlu0 %520 }
 0x1a4   :  { %v531_v15 = vmul.f32 0.03125, %v521_v14  ;;  %v564_v16 = vsel %vm500_vm0, %v546_v13, 0.0  ;;  %v586_v14 = vld [vmem:[%s1318_s2 + $0x28] sm:$0xff] }
 0x1a5   :  { %v524_v17 = vpop.xlane.xlu1 %523  ;;  %565 = vadd.xlane.f32.xlu1 %v564_v16  ;;  %v587_v16 = vld [vmem:[%s1318_s2 + $0x30] sm:$0xff] }
 0x1a6   :  { %v1217_v18 = vsub.f32 %v494_v44, %v531_v15  ;;  %v532_v19 = vmul.f32 0.03125, %v524_v17 }
 0x1a8   :  { %v1219_v20 = vsub.f32 %v497_v46, %v532_v19  ;;  %v547_v21 = vmul.f32 %v1217_v18, %v1217_v18 }
 0x1aa   :  { %v567_v22 = vsel %vm500_vm0, %v547_v21, 0.0  ;;  %v548_v23 = vmul.f32 %v1219_v20, %v1219_v20 }
 0x1ab   :  { %568 = vadd.xlane.f32.xlu0 %v567_v22  ;;  %v588_v22 = vld [vmem:[%s1318_s2 + $0x38] sm:$0xff] }
 0x1ac   :  { %v570_v24 = vsel %vm500_vm0, %v548_v23, 0.0 }
 0x1ad   :  { %571 = vadd.xlane.f32.xlu1 %v570_v24  ;;  %v667_v24 = vld [vmem:[%s1317_s3 + $0x30] sm:$0xff] }
 0x1be   :  { %671 = vperm.xlu1 %931, %v661_v25  }
 0x1c1   :  { %676 = vperm.xlu0 %932, %v662_v26  }
 0x1c2   :  { %681 = vperm.xlu1 %931, %v663_v27  }
 0x1c5   :  { %686 = vperm.xlu0 %932, %v664_v28  }
 0x1c6   :  { %691 = vperm.xlu1 %931, %v665_v29  }
 0x1c9   :  { %696 = vperm.xlu0 %932, %v666_v30  }
 0x220   :  { %v551_v31 = vpop.xlane.xlu0 %550 }
 0x221   :  { %v573_v32 = vmul.f32 0.03125, %v551_v31 }
 0x223   :  { %v589_v33 = vadd.f32 1e-05, %v573_v32 }
 0x224   :  { %v554_v34 = vpop.xlane.xlu1 %553 }
 0x225   :  { %989 = vrsqrt.f32 %v589_v33  ;;  %v574_v35 = vmul.f32 0.03125, %v554_v34 }
 0x227   :  { %v590_v36 = vadd.f32 1e-05, %v574_v35 }
 0x228   :  { %v557_v37 = vpop.xlane.xlu0 %556 }
 0x229   :  { %991 = vrsqrt.f32 %v590_v36  ;;  %v575_v38 = vmul.f32 0.03125, %v557_v37 }
 0x22b   :  { %v591_v39 = vadd.f32 1e-05, %v575_v38 }
 0x22c   :  { %v560_v40 = vpop.xlane.xlu1 %559 }
 0x22d   :  { %993 = vrsqrt.f32 %v591_v39  ;;  %v576_v41 = vmul.f32 0.03125, %v560_v40 }
 0x22f   :  { %v990_v43 = vpop.eup %989  ;;  %v592_v44 = vadd.f32 1e-05, %v576_v41 }
 0x230   :  { %v563_v45 = vpop.xlane.xlu0 %562  ;;  %v605_v46 = vmul.f32 %v990_v43, %v581_v42 }
 0x231   :  { %995 = vrsqrt.f32 %v592_v44  ;;  %v577_v47 = vmul.f32 0.03125, %v563_v45 }
 0x232   :  { %v566_v49 = vpop.xlane.xlu1 %565  ;;  %615 = vperm.xlu0 %932, %v605_v46  }
 0x233   :  { %v992_v51 = vpop.eup %991  ;;  %v593_v52 = vadd.f32 1e-05, %v577_v47  ;;  %v578_v53 = vmul.f32 0.03125, %v566_v49 }
 0x234   :  { %v606_v56 = vmul.f32 %v992_v51, %v582_v48 }
 0x235   :  { %997 = vrsqrt.f32 %v593_v52  ;;  %v594_v57 = vadd.f32 1e-05, %v578_v53 }
 0x236   :  { %620 = vperm.xlu1 %931, %v606_v56   ;;  %706 = vperm.xlu0 %932, %v668_v55  }
 0x237   :  { %v994_v60 = vpop.eup %993  ;;  %999 = vrsqrt.f32 %v594_v57 }
 0x238   :  { %v569_v61 = vpop.xlane.xlu0 %568  ;;  %v607_v63 = vmul.f32 %v994_v60, %v583_v58 }
 0x239   :  { %v579_v0 = vmul.f32 0.03125, %v569_v61 }
 0x23a   :  { %v572_v2 = vpop.xlane.xlu1 %571  ;;  %625 = vperm.xlu1 %931, %v607_v63  }
 0x23b   :  { %v996_v3 = vpop.eup %995  ;;  %v595_v4 = vadd.f32 1e-05, %v579_v0  ;;  %v580_v5 = vmul.f32 0.03125, %v572_v2 }
 0x23c   :  { %v608_v7 = vmul.f32 %v996_v3, %v584_v1 }
 0x23d   :  { %1001 = vrsqrt.f32 %v595_v4  ;;  %v596_v8 = vadd.f32 1e-05, %v580_v5 }
 0x23e   :  { %630 = vperm.xlu1 %931, %v608_v7   ;;  %v672_v26 = vpop.permute.xlu1 %671 }
 0x23f   :  { %v998_v11 = vpop.eup %997  ;;  %1003 = vrsqrt.f32 %v596_v8 }
 0x240   :  { %v609_v12 = vmul.f32 %v998_v11, %v585_v10  ;;  %v677_v25 = vpop.permute.xlu0 %676 }
 0x241   :  { %v1000_v13 = vpop.eup %999 }
 0x242   :  { %635 = vperm.xlu1 %931, %v609_v12   ;;  %v610_v15 = vmul.f32 %v1000_v13, %v586_v14  ;;  %v682_v28 = vpop.permute.xlu1 %681 }
 0x244   :  { %v687_v27 = vpop.permute.xlu0 %686 }
 0x246   :  { %640 = vperm.xlu1 %931, %v610_v15   ;;  %v692_v30 = vpop.permute.xlu1 %691 }
 0x247   :  { %v1002_v17 = vpop.eup %1001 }
 0x248   :  { %v611_v19 = vmul.f32 %v1002_v17, %v587_v16  ;;  %v697_v29 = vpop.permute.xlu0 %696 }
 0x249   :  { %v1004_v21 = vpop.eup %1003 }
 0x24a   :  { %645 = vperm.xlu1 %931, %v611_v19   ;;  %v612_v23 = vmul.f32 %v1004_v21, %v588_v22 }
 0x24e   :  { %650 = vperm.xlu1 %931, %v612_v23  }
 0x252   :  { %701 = vperm.xlu1 %931, %v667_v24  }
 0x2b1   :  { %v616_v31 = vpop.permute.xlu0 %615 }
 0x2b2   :  { %v653_v32 = vmul.f32 %v616_v31, %v1186_v50 }
 0x2b4   :  { %v709_v33 = vadd.f32 %v672_v26, %v653_v32 }
 0x2b5   :  { %v621_v34 = vpop.permute.xlu1 %620  ;;  %v707_v4 = vpop.permute.xlu0 %706 }
 0x2b6   :  { %vm717_vm1 = vcmp.ge.f32.partialorder %v709_v33, 0.0  ;;  %v725_v35 = vmul.f32 0.2, %v709_v33  ;;  %v654_v36 = vmul.f32 %v621_v34, %v1191_v54 }
 0x2b8   :  { %v733_v37 = vsel %vm717_vm1, %v709_v33, %v725_v35  ;;  %v710_v38 = vadd.f32 %v677_v25, %v654_v36 }
 0x2b9   :  { %v842_v39 = vpack.c.bf16 %v733_v37, %v733_v37  ;;  %v626_v40 = vpop.permute.xlu1 %625 }
 0x2ba   :  { %vm718_vm3 = vcmp.ge.f32.partialorder %v710_v38, 0.0  ;;  %v726_v41 = vmul.f32 0.2, %v710_v38  ;;  %v655_v42 = vmul.f32 %v626_v40, %v1196_v59 }
 0x2bb   :  { %774 = vst.msk [vmem:[%s1319_s4] sm:$0xf] %vm773_vm2, %v842_v39 }
 0x2bc   :  { %v734_v50 = vsel %vm718_vm3, %v710_v38, %v726_v41  ;;  %v711_v43 = vadd.f32 %v682_v28, %v655_v42 }
 0x2bd   :  { %v843_v44 = vpack.c.bf16 %v734_v50, %v734_v50  ;;  %v631_v45 = vpop.permute.xlu1 %630 }
 0x2be   :  { %vm719_vm4 = vcmp.ge.f32.partialorder %v711_v43, 0.0  ;;  %v727_v54 = vmul.f32 0.2, %v711_v43  ;;  %v656_v46 = vmul.f32 %v631_v45, %v1201_v62 }
 0x2bf   :  { %775 = vst.msk [vmem:[%s1319_s4 + $0x4] sm:$0xf] %vm773_vm2, %v843_v44 }
 0x2c0   :  { %v735_v47 = vsel %vm719_vm4, %v711_v43, %v727_v54  ;;  %v712_v59 = vadd.f32 %v687_v27, %v656_v46 }
 0x2c1   :  { %v844_v48 = vpack.c.bf16 %v735_v47, %v735_v47  ;;  %v636_v49 = vpop.permute.xlu1 %635 }
 0x2c2   :  { %vm720_vm5 = vcmp.ge.f32.partialorder %v712_v59, 0.0  ;;  %v728_v51 = vmul.f32 0.2, %v712_v59  ;;  %v657_v52 = vmul.f32 %v636_v49, %v1206_v6 }
 0x2c3   :  { %776 = vst.msk [vmem:[%s1319_s4 + $0x8] sm:$0xf] %vm773_vm2, %v844_v48 }
 0x2c4   :  { %v736_v53 = vsel %vm720_vm5, %v712_v59, %v728_v51  ;;  %v713_v62 = vadd.f32 %v692_v30, %v657_v52 }
 0x2c5   :  { %v845_v55 = vpack.c.bf16 %v736_v53, %v736_v53  ;;  %v641_v56 = vpop.permute.xlu1 %640 }
 0x2c6   :  { %vm721_vm6 = vcmp.ge.f32.partialorder %v713_v62, 0.0  ;;  %v729_v57 = vmul.f32 0.2, %v713_v62  ;;  %v658_v58 = vmul.f32 %v641_v56, %v1209_v9 }
 0x2c7   :  { %777 = vst.msk [vmem:[%s1319_s4 + $0xc] sm:$0xf] %vm773_vm2, %v845_v55 }
 0x2c8   :  { %v737_v60 = vsel %vm721_vm6, %v713_v62, %v729_v57  ;;  %v714_v6 = vadd.f32 %v697_v29, %v658_v58 }
 0x2c9   :  { %v846_v61 = vpack.c.bf16 %v737_v60, %v737_v60  ;;  %v646_v63 = vpop.permute.xlu1 %645 }
 0x2ca   :  { %vm722_vm7 = vcmp.ge.f32.partialorder %v714_v6, 0.0  ;;  %v730_v0 = vmul.f32 0.2, %v714_v6  ;;  %v659_v5 = vmul.f32 %v646_v63, %v1217_v18 }
 0x2cb   :  { %778 = vst.msk [vmem:[%s1319_s4 + $0x10] sm:$0xf] %vm773_vm2, %v846_v61 }
 0x2cc   :  { %v738_v1 = vsel %vm722_vm7, %v714_v6, %v730_v0 }
 0x2cd   :  { %v847_v2 = vpack.c.bf16 %v738_v1, %v738_v1  ;;  %v651_v3 = vpop.permute.xlu1 %650 }
 0x2ce   :  { %v660_v9 = vmul.f32 %v651_v3, %v1219_v20 }
 0x2cf   :  { %779 = vst.msk [vmem:[%s1319_s4 + $0x14] sm:$0xf] %vm773_vm2, %v847_v2 }
 0x2d0   :  { %v716_v7 = vadd.f32 %v707_v4, %v660_v9 }
 0x2d1   :  { %v702_v8 = vpop.permute.xlu1 %701 }
 0x2d2   :  { %vm724_vm8 = vcmp.ge.f32.partialorder %v716_v7, 0.0  ;;  %v732_v10 = vmul.f32 0.2, %v716_v7  ;;  %v715_v11 = vadd.f32 %v702_v8, %v659_v5 }
 0x2d4   :  { %v740_v12 = vsel %vm724_vm8, %v716_v7, %v732_v10  ;;  %vm723_vm9 = vcmp.ge.f32.partialorder %v715_v11, 0.0  ;;  %v731_v13 = vmul.f32 0.2, %v715_v11 }
 0x2d5   :  { %v849_v14 = vpack.c.bf16 %v740_v12, %v740_v12 }
 0x2d6   :  { %v739_v15 = vsel %vm723_vm9, %v715_v11, %v731_v13 }
 0x2d7   :  { %781 = vst.msk [vmem:[%s1319_s4 + $0x1c] sm:$0xf] %vm773_vm2, %v849_v14  ;;  %v848_v20 = vpack.c.bf16 %v739_v15, %v739_v15 }
 0x2d9   :  { %780 = vst.msk [vmem:[%s1319_s4 + $0x18] sm:$0xf] %vm773_vm2, %v848_v20 }

// kernel: discriminator_forward.9
= control target key start
LH: loop header
LB: loop body
LE: loop exit
PB: predicated region body
PF: predicated region fallthrough
CT: control target
= control target key end

     0   :  { %s1279_s0 = inlined_call_operand.vmem [shape: bf16[1024,2], index: 0, kind: input, shape index: {}]   ;;  %s1280_s1 = inlined_call_operand.vmem [shape: bf16[1,1024], index: 1, kind: input, shape index: {}]   ;;  %s1281_s2 = inlined_call_operand.<no memory space> [shape: f32[1,1], index: 2, kind: input, shape index: {}]   ;;  %s1282_s3 = inlined_call_operand.hbm [shape: f32[1,2], index: 3, kind: output, shape index: {}]  }
   0x1   :  { %v8_v0 = vstv %s1281_s2 }
   0x2   :  { %9 = vst [vmem:[#allocation2] sm:$0x1] %v8_v0 }
   0x3   :  { %v936_v1 = vld [vmem:[%s1279_s0 + $0x40] sm:$0xff]   ;;  %v1029_v3 = vmov 0   ;;  %v940_v6 = vld [vmem:[%s1279_s0 + $0x48] sm:$0xff]   ;;  %v944_v10 = vld [vmem:[%s1279_s0 + $0x50] sm:$0xff]   ;;  %v153_v30 = vlaneseq  ;;  %v1030_v38 = vmov 1966171168  }
   0x4   :  { %v937_v2 = vld [vmem:[%s1279_s0 + $0xc0] sm:$0xff]   ;;  %935 = vset.pattern.permute.xlu0 %v1029_v3  ;;  %844 = vmatprep.subr.bf16.mxu0 %v936_v1  ;;  %v941_v7 = vld [vmem:[%s1279_s0 + $0xc8] sm:$0xff]   ;;  %v945_v11 = vld [vmem:[%s1279_s0 + $0xd0] sm:$0xff]   ;;  %v160_v39 = vunpack.c.l.s4 %v1030_v38 }
   0x5   :  { %v938_v4 = vld [vmem:[%s1279_s0] sm:$0xff]   ;;  %866 = vmatprep.subr.bf16.mxu1 %v937_v2  ;;  %v942_v8 = vld [vmem:[%s1279_s0 + $0x8] sm:$0xff]   ;;  %v946_v12 = vld [vmem:[%s1279_s0 + $0x10] sm:$0xff]   ;;  %v1151_v35 = vshrl.u32 %v153_v30, 7 }
   0x6   :  { %v939_v5 = vld [vmem:[%s1279_s0 + $0x80] sm:$0xff]   ;;  %845 = vmatpush3.bf16.msra.mxu0 %v938_v4  ;;  %v943_v9 = vld [vmem:[%s1279_s0 + $0x88] sm:$0xff]   ;;  %v947_v13 = vld [vmem:[%s1279_s0 + $0x90] sm:$0xff]   ;;  %v161_v42 = vunpack.c.0.s8 %v160_v39 }
   0x7   :  { %867 = vmatpush3.bf16.msra.mxu1 %v939_v5  ;;  %846 = vmatprep.subr.bf16.mxu0 %v940_v6  ;;  %v948_v14 = vld [vmem:[%s1279_s0 + $0x58] sm:$0xff]   ;;  %v952_v18 = vld [vmem:[%s1279_s0 + $0x60] sm:$0xff]   ;;  %v956_v22 = vld [vmem:[%s1279_s0 + $0x68] sm:$0xff]  }
   0x8   :  { %868 = vmatprep.subr.bf16.mxu1 %v941_v7  ;;  %v949_v15 = vld [vmem:[%s1279_s0 + $0xd8] sm:$0xff]   ;;  %v953_v19 = vld [vmem:[%s1279_s0 + $0xe0] sm:$0xff]   ;;  %v957_v23 = vld [vmem:[%s1279_s0 + $0xe8] sm:$0xff]   ;;  %v1163_v43 = vsub.s32 %v161_v42, %v1151_v35 }
   0x9   :  { %v950_v16 = vld [vmem:[%s1279_s0 + $0x18] sm:$0xff]   ;;  %v954_v20 = vld [vmem:[%s1279_s0 + $0x20] sm:$0xff]   ;;  %v958_v24 = vld [vmem:[%s1279_s0 + $0x28] sm:$0xff]  }
   0xa   :  { %847 = vmatpush3.bf16.msra.mxu0 %v942_v8  ;;  %v951_v17 = vld [vmem:[%s1279_s0 + $0x98] sm:$0xff]   ;;  %v955_v21 = vld [vmem:[%s1279_s0 + $0xa0] sm:$0xff]   ;;  %v959_v25 = vld [vmem:[%s1279_s0 + $0xa8] sm:$0xff]  }
   0xb   :  { %869 = vmatpush3.bf16.msra.mxu1 %v943_v9  ;;  %848 = vmatprep.subr.bf16.mxu0 %v944_v10  ;;  %v960_v26 = vld [vmem:[%s1279_s0 + $0x70] sm:$0xff]   ;;  %v964_v31 = vld [vmem:[%s1279_s0 + $0x78] sm:$0xff]   ;;  %v18_v36 = vld [vmem:[%s1280_s1] sm:$0xff] }
   0xc   :  { %870 = vmatprep.subr.bf16.mxu1 %v945_v11  ;;  %v961_v27 = vld [vmem:[%s1279_s0 + $0xf0] sm:$0xff]   ;;  %v965_v32 = vld [vmem:[%s1279_s0 + $0xf8] sm:$0xff]   ;;  %v969_v37 = vld [vmem:[%s1279_s0 + $0x140] sm:$0xff]   ;;  %v158_v41 = vcombine.high %v18_v36, %v18_v36  ;;  %v165_v44 = vrot.slane %v18_v36, %v1163_v43 }
   0xd   :  { %v962_v28 = vld [vmem:[%s1279_s0 + $0x30] sm:$0xff]   ;;  %v966_v33 = vld [vmem:[%s1279_s0 + $0x38] sm:$0xff]   ;;  %v970_v40 = vld [vmem:[%s1279_s0 + $0x1c0] sm:$0xff]  }
   0xe   :  { %849 = vmatpush3.bf16.msra.mxu0 %v946_v12  ;;  %v963_v29 = vld [vmem:[%s1279_s0 + $0xb0] sm:$0xff]   ;;  %v967_v34 = vld [vmem:[%s1279_s0 + $0xb8] sm:$0xff]   ;;  %v1167_v45 = vrot.slane %v158_v41, %v1163_v43  ;;  %v173_v46 = vcombine.high %v165_v44, %v165_v44  ;;  %v181_v47 = vrot.slane %v165_v44, %v1163_v43  ;;  %v971_v50 = vld [vmem:[%s1279_s0 + $0x100] sm:$0xff]  }
   0xf   :  { %871 = vmatpush3.bf16.msra.mxu1 %v947_v13  ;;  %850 = vmatprep.subr.bf16.mxu0 %v948_v14  ;;  %v973_v53 = vld [vmem:[%s1279_s0 + $0x148] sm:$0xff]   ;;  %v972_v55 = vld [vmem:[%s1279_s0 + $0x180] sm:$0xff]   ;;  %v977_v59 = vld [vmem:[%s1279_s0 + $0x150] sm:$0xff]  }
  0x10   :  { %872 = vmatprep.subr.bf16.mxu1 %v949_v15  ;;  %v174_v48 = vcombine.high %v1167_v45, %v1167_v45  ;;  %v195_v49 = vrot.slane %v173_v46, %v1163_v43  ;;  %v203_v52 = vcombine.high %v181_v47, %v181_v47  ;;  %v974_v56 = vld [vmem:[%s1279_s0 + $0x1c8] sm:$0xff]   ;;  %v978_v61 = vld [vmem:[%s1279_s0 + $0x1d0] sm:$0xff]   ;;  %v981_v63 = vld [vmem:[%s1279_s0 + $0x158] sm:$0xff]  }
  0x11   :  { %v975_v58 = vld [vmem:[%s1279_s0 + $0x108] sm:$0xff]   ;;  %v979_v62 = vld [vmem:[%s1279_s0 + $0x110] sm:$0xff]   ;;  %v982_v1 = vld [vmem:[%s1279_s0 + $0x1d8] sm:$0xff]  }
  0x12   :  { %851 = vmatpush3.bf16.msra.mxu0 %v950_v16  ;;  %v202_v51 = vrot.slane %v174_v48, %v1163_v43  ;;  %631 = vmatprep.mubr.bf16.mxu0 %v195_v49  ;;  %v205_v54 = vcombine.high %v195_v49, %v195_v49  ;;  %v976_v60 = vld [vmem:[%s1279_s0 + $0x188] sm:$0xff]   ;;  %v980_v0 = vld [vmem:[%s1279_s0 + $0x190] sm:$0xff]   ;;  %v983_v2 = vld [vmem:[%s1279_s0 + $0x118] sm:$0xff]  }
  0x13   :  { %873 = vmatpush3.bf16.msra.mxu1 %v951_v17  ;;  %852 = vmatprep.subr.bf16.mxu0 %v952_v18  ;;  %v985_v3 = vld [vmem:[%s1279_s0 + $0x160] sm:$0xff]   ;;  %v984_v4 = vld [vmem:[%s1279_s0 + $0x198] sm:$0xff]   ;;  %v989_v7 = vld [vmem:[%s1279_s0 + $0x168] sm:$0xff]  }
  0x14   :  { %874 = vmatprep.subr.bf16.mxu1 %v953_v19  ;;  %v206_v57 = vcombine.high %v202_v51, %v202_v51  ;;  %671 = vmatprep.mubr.bf16.mxu1 %v205_v54  ;;  %v986_v5 = vld [vmem:[%s1279_s0 + $0x1e0] sm:$0xff]   ;;  %v990_v9 = vld [vmem:[%s1279_s0 + $0x1e8] sm:$0xff]   ;;  %v993_v11 = vld [vmem:[%s1279_s0 + $0x170] sm:$0xff]  }
  0x15   :  { %v987_v6 = vld [vmem:[%s1279_s0 + $0x120] sm:$0xff]   ;;  %v991_v10 = vld [vmem:[%s1279_s0 + $0x128] sm:$0xff]  }
  0x16   :  { %853 = vmatpush3.bf16.msra.mxu0 %v954_v20  ;;  %v988_v8 = vld [vmem:[%s1279_s0 + $0x1a0] sm:$0xff]  }
  0x17   :  { %875 = vmatpush3.bf16.msra.mxu1 %v955_v21  ;;  %854 = vmatprep.subr.bf16.mxu0 %v956_v22  ;;  %v147_v12 = vld [vmem:[#allocation2] sm:$0x1] }
  0x18   :  { %876 = vmatprep.subr.bf16.mxu1 %v957_v23 }
  0x1a   :  { %855 = vmatpush3.bf16.msra.mxu0 %v958_v24 }
  0x1b   :  { %877 = vmatpush3.bf16.msra.mxu1 %v959_v25  ;;  %856 = vmatprep.subr.bf16.mxu0 %v960_v26 }
  0x1c   :  { %878 = vmatprep.subr.bf16.mxu1 %v961_v27 }
  0x1e   :  { %857 = vmatpush3.bf16.msra.mxu0 %v962_v28 }
  0x1f   :  { %879 = vmatpush3.bf16.msra.mxu1 %v963_v29  ;;  %858 = vmatprep.subr.bf16.mxu0 %v964_v31 }
  0x20   :  { %880 = vmatprep.subr.bf16.mxu1 %v965_v32 }
  0x22   :  { %859 = vmatpush3.bf16.msra.mxu0 %v966_v33 }
  0x23   :  { %881 = vmatpush3.bf16.msra.mxu1 %v967_v34  ;;  %888 = vmatprep.subr.bf16.mxu0 %v969_v37 }
  0x24   :  { %910 = vmatprep.subr.bf16.mxu1 %v970_v40 }
  0x25   :  { %632 = vmatmul.mubr.bf16.vlgmr.msra.gmra.mrb[0].mxu0 %v181_v47 }
  0x26   :  { %889 = vmatpush3.bf16.msra.mxu0 %v971_v50  ;;  %672 = vmatmul.mubr.bf16.vlgmr.msra.gmra.mrb[0].mxu1 %v203_v52 }
  0x27   :  { %890 = vmatprep.subr.bf16.mxu0 %v973_v53  ;;  %911 = vmatpush3.bf16.msra.mxu1 %v972_v55 }
  0x28   :  { %711 = vmatprep.mubr.bf16.mxu0 %v202_v51  ;;  %912 = vmatprep.subr.bf16.mxu1 %v974_v56 }
  0x29   :  { %751 = vmatprep.mubr.bf16.mxu1 %v206_v57 }
  0x2a   :  { %891 = vmatpush3.bf16.msra.mxu0 %v975_v58 }
  0x2b   :  { %892 = vmatprep.subr.bf16.mxu0 %v977_v59  ;;  %913 = vmatpush3.bf16.msra.mxu1 %v976_v60 }
  0x2c   :  { %914 = vmatprep.subr.bf16.mxu1 %v978_v61 }
  0x2e   :  { %893 = vmatpush3.bf16.msra.mxu0 %v979_v62 }
  0x2f   :  { %894 = vmatprep.subr.bf16.mxu0 %v981_v63  ;;  %915 = vmatpush3.bf16.msra.mxu1 %v980_v0 }
  0x30   :  { %916 = vmatprep.subr.bf16.mxu1 %v982_v1 }
  0x32   :  { %895 = vmatpush3.bf16.msra.mxu0 %v983_v2 }
  0x33   :  { %896 = vmatprep.subr.bf16.mxu0 %v985_v3  ;;  %917 = vmatpush3.bf16.msra.mxu1 %v984_v4 }
  0x34   :  { %918 = vmatprep.subr.bf16.mxu1 %v986_v5 }
  0x36   :  { %897 = vmatpush3.bf16.msra.mxu0 %v987_v6 }
  0x37   :  { %898 = vmatprep.subr.bf16.mxu0 %v989_v7 }
  0x38   :  { %10 = vsyncpa [#allocation4], 0  ;;  %919 = vmatpush3.bf16.msra.mxu1 %v988_v8  ;;  %v992_v13 = vld [vmem:[%s1279_s0 + $0x1a8] sm:$0xff]   ;;  %150 = vperm.xlu0 %935, %v147_v12   ;;  %v994_v14 = vld [vmem:[%s1279_s0 + $0x1f0] sm:$0xff]   ;;  %v188_v20 = vrot.slane %v1167_v45, %v1163_v43  ;;  %v155_v23 = vsub.s32 0, %v1151_v35  ;;  %vm764_vm0 = vcmask 8192  }
  0x39   :  { %920 = vmatprep.subr.bf16.mxu1 %v990_v9  ;;  %v995_v15 = vld [vmem:[%s1279_s0 + $0x130] sm:$0xff]   ;;  %v997_v16 = vld [vmem:[%s1279_s0 + $0x178] sm:$0xff]  }
  0x3a   :  { %899 = vmatpush3.bf16.msra.mxu0 %v991_v10  ;;  %v996_v17 = vld [vmem:[%s1279_s0 + $0x1b0] sm:$0xff]   ;;  %v998_v18 = vld [vmem:[%s1279_s0 + $0x1f8] sm:$0xff]   ;;  %v204_v22 = vcombine.high %v188_v20, %v188_v20 }
  0x3b   :  { %900 = vmatprep.subr.bf16.mxu0 %v993_v11  ;;  %v999_v19 = vld [vmem:[%s1279_s0 + $0x138] sm:$0xff]  }
  0x3c   :  { %921 = vmatpush3.bf16.msra.mxu1 %v992_v13  ;;  %v1000_v21 = vld [vmem:[%s1279_s0 + $0x1b8] sm:$0xff]   ;;  %s1031_s0 = smov [#allocation3]  }
  0x3d   :  { %922 = vmatprep.subr.bf16.mxu1 %v994_v14  ;;  %s772_s28 = sshll.u32 %s1031_s0, 4  ;;  %s773_s28 = int_to_ptr.vmem [resolvable:$true] %s772_s28 }
  0x3e   :  { %901 = vmatpush3.bf16.msra.mxu0 %v995_v15  ;;  %s1005_s29 = scalar_lea.vmem %s773_s28, 16  ;;  %s1009_s30 = scalar_lea.vmem %s773_s28, 32 }
  0x3f   :  { %902 = vmatprep.subr.bf16.mxu0 %v997_v16  ;;  %p1006_p0 = scmp.ne.s32.totalorder %s773_s28, %s1005_s29  ;;  %p1010_p1 = scmp.lt.s32.totalorder %s773_s28, %s773_s28 }
  0x40   :  { %923 = vmatpush3.bf16.msra.mxu1 %v996_v17  ;;  %p1011_p2 = scmp.lt.s32.totalorder %s1009_s30, %s1005_s29 }
  0x41   :  { %924 = vmatprep.subr.bf16.mxu1 %v998_v18 }
  0x42   :  { %903 = vmatpush3.bf16.msra.mxu0 %v999_v19  ;;  %p1012_p3 = por %p1011_p2, %p1010_p1 }
  0x44   :  { %925 = vmatpush3.bf16.msra.mxu1 %v1000_v21  ;;  %p1013_p4 = pnand %p1012_p3, %p1006_p0 }
  0x45   :  { %712 = vmatmul.mubr.bf16.vlgmr.msra.gmra.mrb[4].mxu0 %v188_v20 }
  0x47   :  { %752 = vmatmul.mubr.bf16.vlgmr.msra.gmra.mrb[4].mxu1 %v204_v22 }
  0xb7   :  { %v151_v24 = vpop.permute.xlu0 %150 }
  0xb8   :  { %v156_v26 = vrot.slane %v151_v24, %v155_v23 }
  0xf8   :  { %v860_v25 = vpop.f32.mrb[0].mxu0 }
  0xf9   :  { %v861_v27 = vpop.f32.mrb[1].mxu0  ;;  %v882_v28 = vpop.f32.mrb[0].mxu1 }
  0xfa   :  { %v862_v29 = vadd.f32 %v861_v27, %v860_v25  ;;  %v863_v30 = vpop.f32.mrb[2].mxu0  ;;  %v883_v31 = vpop.f32.mrb[1].mxu1 }
  0xfb   :  { %v864_v32 = vpop.f32.mrb[3].mxu0  ;;  %v884_v34 = vadd.f32 %v883_v31, %v882_v28  ;;  %v885_v36 = vpop.f32.mrb[2].mxu1 }
  0xfc   :  { %v634_v33 = vadd.f32 %v862_v29, %v156_v26  ;;  %v886_v37 = vpop.f32.mrb[3].mxu1 }
  0xfe   :  { %v674_v38 = vadd.f32 %v884_v34, %v634_v33 }
 0x118   :  { %v904_v39 = vpop.f32.mrb[4].mxu0 }
 0x119   :  { %v905_v40 = vpop.f32.mrb[5].mxu0 }
 0x11a   :  { %v926_v41 = vpop.f32.mrb[4].mxu1  ;;  %v906_v42 = vadd.f32 %v905_v40, %v904_v39  ;;  %v907_v43 = vpop.f32.mrb[6].mxu0 }
 0x11b   :  { %v927_v35 = vpop.f32.mrb[5].mxu1  ;;  %v908_v44 = vpop.f32.mrb[7].mxu0 }
 0x11c   :  { %v714_v45 = vadd.f32 %v906_v42, %v674_v38  ;;  %v928_v46 = vadd.f32 %v927_v35, %v926_v41  ;;  %v929_v47 = vpop.f32.mrb[6].mxu1 }
 0x11d   :  { %v930_v48 = vpop.f32.mrb[7].mxu1 }
 0x11e   :  { %v754_v49 = vadd.f32 %v928_v46, %v714_v45 }
 0x120   :  { %v759_v50 = vsub.f32 0.0, %v754_v49 }
 0x122   :  { %v760_v51 = vmul.f32 1.442695, %v759_v50 }
 0x124   :  { %1001 = vpow2.f32 %v760_v51 }
 0x12e   :  { %v1002_v52 = vpop.eup %1001 }
 0x12f   :  { %v762_v53 = vadd.f32 1.0, %v1002_v52 }
 0x131   :  { %1003 = vrcp.f32 %v762_v53 }
 0x13b   :  { %v1004_v54 = vpop.eup %1003 }
 0x13c   :  { %765 = vst.msk [vmem:[#allocation3] sm:$0x1] %vm764_vm0, %v1004_v54 }
 0x13d   :  { %1016 = shalt.err (!%p1013_p4)
}
 0x13e   :  { %s1017_s6 = scalar_lea.hbm %s1282_s3, 16 }
 0x13f   :  { %p1018_p5 = scmp.ne.s32.totalorder %s1282_s3, %s1017_s6  ;;  %p1021_p6 = scmp.lt.u32.totalorder %s1017_s6, %s1282_s3 }
 0x141   :  { %p1023_p7 = pnand %p1021_p6, %p1018_p5 }
 0x143   :  { %1026 = shalt.err (!%p1023_p7)
}
 0x144   :  { %775 = dma.vmem_to_hbm [thread:$0]  %s773_s28, 16, %s1282_s3, [#allocation4]  }
 0x145   :  { %1027 = dma.done.wait [#allocation4], 16  }
 0x146   :  { %1028 = vsyncadd [#allocation4], 4294967280 }
 0x147   :  { %779 = vsyncpa [#allocation4], 1 }

</bundles_post_ra>
